<compile_context>
chip_gen: v7x
topology: tpu7x:2x2x1
jax: 0.10.0
libtpu: 0.0.40
codegen_flags: <defaults>
</compile_context>

<pallas_src>
import functools
import numpy as np
import jax
import jax.numpy as jnp
from jax.experimental import pallas as pl
from jax.experimental.pallas import tpu as pltpu


def _round_up(x, m):
    return (x + m - 1) // m * m


def _ceil_div(a, b):
    return -(-a // b)


# ----------------------------- Pallas kernels ------------------------------

def _mm_bias_act_kernel(a_ref, b_ref, bias_ref, o_ref, *, slope):
    """One wide MXU dot (complex structure + BN/bias affine folded into B's columns),
    then bias-add + CLeakyReLU epilogue, stored lane-dense on 2*Cout channels."""
    z = jnp.dot(a_ref[0], b_ref[0], preferred_element_type=jnp.float32)
    z = z + bias_ref[...]
    if slope != 1.0:                      # slope==1.0 -> identity (last decoder, no act)
        z = jnp.where(z >= 0, z, slope * z)
    o_ref[0] = z.astype(o_ref.dtype)


_TM_CANDIDATES = (2048, 1024, 512, 384, 256, 128)


def _pick_tm(m):
    """Row-tile choice: minimize padding waste; 16-row multiples for bf16 sublane packing;
    keep >=2 grid steps for large M so v7x's two TensorCores both get work."""
    if m <= 256:
        return _round_up(max(m, 16), 16)          # tiny problem: one tile
    best_tm, best_waste = 128, _round_up(m, 128) - m
    for tm in _TM_CANDIDATES:
        if tm >= m:
            continue
        waste = _round_up(m, tm) - m
        if waste < best_waste or (waste == best_waste and tm > best_tm):
            best_tm, best_waste = tm, waste
    return best_tm


def cplx_mm_bias_act(a, b, bias, slope, out_dtype):
    """a: (P, M, K) bf16;  b: (P, K, C2) bf16;  bias: (1, C2) f32  ->  (P, M, C2) out_dtype."""
    P, M, K = a.shape
    C2 = b.shape[2]
    TM = _pick_tm(M)
    Mp = _round_up(M, TM)
    if Mp != M:
        a = jnp.pad(a, ((0, 0), (0, Mp - M), (0, 0)))
    itemsize = jnp.dtype(out_dtype).itemsize
    cost = pl.CostEstimate(
        flops=int(2 * P * Mp * K * C2),
        transcendentals=0,
        bytes_accessed=int(P * (Mp * K + K * C2) * 2 + P * Mp * C2 * itemsize + C2 * 4))

    out = pl.pallas_call(
        functools.partial(_mm_bias_act_kernel, slope=float(slope)),
        out_shape=jax.ShapeDtypeStruct((P, Mp, C2), out_dtype),
        grid_spec=pltpu.PrefetchScalarGridSpec(
            num_scalar_prefetch=0,
            grid=(P, Mp // TM),
            in_specs=[
                # No K / C padding: last dims of every block equal the full array extents.
                pl.BlockSpec((1, TM, K), lambda p, i: (p, i, 0)),
                pl.BlockSpec((1, K, C2), lambda p, i: (p, 0, 0)),
                pl.BlockSpec((1, C2), lambda p, i: (0, 0)),
            ],
            out_specs=pl.BlockSpec((1, TM, C2), lambda p, i: (p, i, 0)),
        ),
        compiler_params=pltpu.CompilerParams(
            dimension_semantics=("parallel", "parallel"),
            vmem_limit_bytes=32 * 1024 * 1024),
        cost_estimate=cost,
    )(a, b, bias)
    if Mp != M:
        out = out[:, :M]
    return out


def _ratio_mask_kernel(o_ref, x_ref, y_ref):
    # Exact sigmoid via one EUP tanh: sigmoid(x) = 0.5*tanh(0.5*x) + 0.5
    s = 0.5 * jnp.tanh(0.5 * o_ref[...]) + 0.5
    y_ref[...] = s * x_ref[...]


def ratio_mask_bdss(out_cat, in_cat):
    """Elementwise sigmoid(out)*in on lane-dense tiles; both args are packed (N,H,W,2)."""
    shp = out_cat.shape
    T = int(np.prod(shp))
    LANE = 1024 if T >= 8 * 1024 else 512
    rows = _ceil_div(T, LANE)
    TR = min(256, _round_up(rows, 8))
    rows_p = _round_up(rows, TR)
    Tp = rows_p * LANE

    def prep(x):
        return jnp.pad(x.astype(jnp.float32).reshape(-1), (0, Tp - T)).reshape(rows_p, LANE)

    y = pl.pallas_call(
        _ratio_mask_kernel,
        out_shape=jax.ShapeDtypeStruct((rows_p, LANE), jnp.float32),
        grid_spec=pltpu.PrefetchScalarGridSpec(
            num_scalar_prefetch=0,
            grid=(rows_p // TR,),
            in_specs=[pl.BlockSpec((TR, LANE), lambda i: (i, 0))] * 2,
            out_specs=pl.BlockSpec((TR, LANE), lambda i: (i, 0)),
        ),
        compiler_params=pltpu.CompilerParams(dimension_semantics=("parallel",)),
    )(prep(out_cat), prep(in_cat))
    return y.reshape(-1)[:T].reshape(shp)


# ------------------------------- JAX glue -----------------------------------

def im2col_nhwc(x, kh, kw, sh, sw, ph, pw):
    """Packed NHWC -> (N, OH, OW, kh*kw*C) patches (tap-major, channel-minor)."""
    # TODO(synk): move tap gathering in-kernel (strided VMEM slices / manual DMA) to drop the
    # kh*kw/(sh*sw)x HBM patch blowup -- matters most on v5e/v6e where HBM BW is 2-4x lower.
    N, H, W, C = x.shape
    xp = jnp.pad(x, ((0, 0), (ph, ph), (pw, pw), (0, 0)))
    OH = (H + 2 * ph - kh) // sh + 1
    OW = (W + 2 * pw - kw) // sw + 1
    cols = []
    for i in range(kh):
        for j in range(kw):
            cols.append(xp[:, i:i + sh * (OH - 1) + 1:sh,
                           j:j + sw * (OW - 1) + 1:sw, :])
    return jnp.concatenate(cols, axis=-1), OH, OW


def conv_transpose_phase_plan(kh, kw, sh, sw, ph, pw):
    """Sub-pixel decomposition of ConvTranspose2d: per output phase (rh, rw), a stride-1
    tap set.  out[s*m + r] = sum_{k == (r+p) mod s} x[m + (r+p-k)//s] * W[k]."""
    plan = []
    for rh in range(sh):
        taps_h = [(k, (rh + ph - k) // sh) for k in range(kh) if (rh + ph - k) % sh == 0]
        for rw in range(sw):
            taps_w = [(k, (rw + pw - k) // sw) for k in range(kw) if (rw + pw - k) % sw == 0]
            plan.append({'rh': rh, 'rw': rw, 'taps_h': taps_h, 'taps_w': taps_w})
    return plan


def _gather_phase_taps(x, phase, mh, mw, off_h, off_w):
    cols = []
    for _, dh in phase['taps_h']:
        for _, dw in phase['taps_w']:
            cols.append(x[:, off_h + dh: off_h + dh + mh,
                          off_w + dw: off_w + dw + mw, :])
    return jnp.concatenate(cols, axis=-1)


def complex_conv2d(z, lp, kernel, stride, padding, slope):
    """Packed complex conv: z is (N, H, W, 2*Cin) with channels [real | imag]."""
    kh, kw = kernel
    sh, sw = stride
    ph, pw = padding
    N = z.shape[0]
    c2 = lp['bias'].shape[1]
    a, OH, OW = im2col_nhwc(z.astype(jnp.bfloat16), kh, kw, sh, sw, ph, pw)
    a = a.reshape(1, N * OH * OW, -1)
    out = cplx_mm_bias_act(a, lp['B'], lp['bias'], slope, jnp.bfloat16)
    return out.reshape(N, OH, OW, c2)


def complex_conv_transpose2d(z, lp, kernel, stride, padding, slope, out_dtype):
    """Packed complex ConvTranspose2d via sub-pixel phases; ALL phases of the layer are
    batched into a single pallas_call (grid axis 0 = phase)."""
    kh, kw = kernel
    sh, sw = stride
    ph, pw = padding
    N, H, W, _ = z.shape
    c2 = lp['bias'].shape[1]
    K = lp['B'].shape[1]
    OH = (H - 1) * sh - 2 * ph + kh
    OW = (W - 1) * sw - 2 * pw + kw
    hq = _ceil_div(OH, sh)
    wq = _ceil_div(OW, sw)
    plan = conv_transpose_phase_plan(kh, kw, sh, sw, ph, pw)

    # Pad the input so every phase can gather a uniform hq x wq window (extra rows produce
    # garbage that the final [:OH, :OW] slice discards).
    pad_t = pad_b = pad_l = pad_r = 0
    for phase in plan:
        if not phase['taps_h'] or not phase['taps_w']:
            continue
        dhs = [d for _, d in phase['taps_h']]
        dws = [d for _, d in phase['taps_w']]
        pad_t = max(pad_t, -min(dhs))
        pad_b = max(pad_b, hq - 1 + max(dhs) - (H - 1))
        pad_l = max(pad_l, -min(dws))
        pad_r = max(pad_r, wq - 1 + max(dws) - (W - 1))

    zb = z.astype(jnp.bfloat16)
    if pad_t or pad_b or pad_l or pad_r:
        zb = jnp.pad(zb, ((0, 0), (pad_t, pad_b), (pad_l, pad_r), (0, 0)))

    a_phases = []
    for phase in plan:
        kt = len(phase['taps_h']) * len(phase['taps_w'])
        if kt == 0:
            a_phases.append(jnp.zeros((N, hq, wq, K), jnp.bfloat16))
            continue
        ap = _gather_phase_taps(zb, phase, hq, wq, pad_t, pad_l)
        if ap.shape[-1] < K:     # phases with fewer taps: zero-pad K (weights are zero there)
            ap = jnp.pad(ap, ((0, 0), (0, 0), (0, 0), (0, K - ap.shape[-1])))
        a_phases.append(ap)
    a = jnp.stack(a_phases, axis=0).reshape(len(plan), N * hq * wq, K)

    out = cplx_mm_bias_act(a, lp['B'], lp['bias'], slope, out_dtype)   # (P, N*hq*wq, c2)

    # TODO(synk): write phases directly into their strided (rh, rw) output positions via a
    # phase-dependent output index_map instead of this interleave round-trip.
    out = out.reshape(sh, sw, N, hq, wq, c2)
    out = jnp.transpose(out, (2, 3, 0, 4, 1, 5)).reshape(N, hq * sh, wq * sw, c2)
    return out[:, :OH, :OW, :]


def pad2d_as_nhwc(x1, x2):
    # Mirrors F.pad(x1, (0, diffW, 0, diffH)) including the negative (crop) case.
    dh = x2.shape[1] - x1.shape[1]
    dw = x2.shape[2] - x1.shape[2]
    x1 = x1[:, :x1.shape[1] + min(dh, 0), :x1.shape[2] + min(dw, 0), :]
    return jnp.pad(x1, ((0, 0), (0, max(dh, 0)), (0, max(dw, 0)), (0, 0)))


def padded_cat_packed(x_up, skip, c_up, c_sk):
    # Complex channel concat in packed [real | imag] layout.
    x_up = pad2d_as_nhwc(x_up, skip)
    return jnp.concatenate([x_up[..., :c_up], skip[..., :c_sk],
                            x_up[..., c_up:], skip[..., c_sk:]], axis=-1)


# --------------------------- parameters / BN fold ---------------------------

def init_complex_bn(key, c):
    ks = jax.random.split(key, 10)
    inv_sqrt2 = np.float32(1.0 / np.sqrt(2.0))
    return {
        'RMr': 0.05 * jax.random.normal(ks[0], (c,), jnp.float32),
        'RMi': 0.05 * jax.random.normal(ks[1], (c,), jnp.float32),
        'RVrr': inv_sqrt2 + 0.1 * jax.random.uniform(ks[2], (c,), jnp.float32),
        'RVii': inv_sqrt2 + 0.1 * jax.random.uniform(ks[3], (c,), jnp.float32),
        'RVri': 0.02 * jax.random.normal(ks[4], (c,), jnp.float32),
        'grr': inv_sqrt2 + 0.05 * jax.random.normal(ks[5], (c,), jnp.float32),
        'gii': inv_sqrt2 + 0.05 * jax.random.normal(ks[6], (c,), jnp.float32),
        'gri': 0.02 * jax.random.normal(ks[7], (c,), jnp.float32),
        'betar': 0.05 * jax.random.normal(ks[8], (c,), jnp.float32),
        'betai': 0.05 * jax.random.normal(ks[9], (c,), jnp.float32),
    }


def fold_complex_bn(bn, eps=1e-5):
    # TODO(synk): inference-mode ComplexBatchNorm (running-stat whitening) folded to a
    # per-channel complex affine; training-mode batch statistics are not computed in-kernel.
    Vrr = bn['RVrr'] + eps
    Vii = bn['RVii'] + eps
    Vri = bn['RVri']
    det = Vrr * Vii - Vri * Vri
    s = jnp.sqrt(det)
    t = jnp.sqrt(Vrr + Vii + 2.0 * s)
    ist = 1.0 / (s * t)
    Wrr = (Vii + s) * ist
    Wii = (Vrr + s) * ist
    Wri = -Vri * ist
    Arr = bn['grr'] * Wrr + bn['gri'] * Wri
    Ari = bn['grr'] * Wri + bn['gri'] * Wii
    Air = bn['gri'] * Wrr + bn['gii'] * Wri
    Aii = bn['gri'] * Wri + bn['gii'] * Wii
    Br = bn['betar'] - (Arr * bn['RMr'] + Ari * bn['RMi'])
    Bi = bn['betai'] - (Air * bn['RMr'] + Aii * bn['RMi'])
    return jnp.stack([Arr, Ari, Air, Aii, Br, Bi], axis=0)


def init_params(key, cfg):
    params = {'encoders': [], 'decoders': []}
    for (cin, cout, k, s, p) in cfg['encoders']:
        key, kw1, kw2, kbn = jax.random.split(key, 4)
        scale = 1.0 / np.sqrt(cin * k[0] * k[1])
        wr = scale * jax.random.normal(kw1, (cout, cin, k[0], k[1]), jnp.float32)
        wi = scale * jax.random.normal(kw2, (cout, cin, k[0], k[1]), jnp.float32)
        params['encoders'].append(
            {'wr': wr, 'wi': wi, 'affine': fold_complex_bn(init_complex_bn(kbn, cout))})
    for (cin, cout, k, s, p) in cfg['decoders'][:-1]:
        key, kw1, kw2, kbn = jax.random.split(key, 4)
        scale = 1.0 / np.sqrt(cin * k[0] * k[1])
        wr = scale * jax.random.normal(kw1, (cin, cout, k[0], k[1]), jnp.float32)
        wi = scale * jax.random.normal(kw2, (cin, cout, k[0], k[1]), jnp.float32)
        params['decoders'].append(
            {'wr': wr, 'wi': wi, 'affine': fold_complex_bn(init_complex_bn(kbn, cout))})
    cin, cout, k, s, p = cfg['decoders'][-1]
    key, kw1, kw2, kb1, kb2 = jax.random.split(key, 5)
    scale = 1.0 / np.sqrt(cin * k[0] * k[1])
    wr = scale * jax.random.normal(kw1, (cin, cout, k[0], k[1]), jnp.float32)
    wi = scale * jax.random.normal(kw2, (cin, cout, k[0], k[1]), jnp.float32)
    b_re = 0.1 * jax.random.normal(kb1, (cout,), jnp.float32)
    b_im = 0.1 * jax.random.normal(kb2, (cout,), jnp.float32)
    ones = jnp.ones((cout,), jnp.float32)
    zeros = jnp.zeros((cout,), jnp.float32)
    # Complex bias of the wrapped pair of real convs: out_r += b_re - b_im, out_i += b_re + b_im.
    params['last'] = {'wr': wr, 'wi': wi,
                      'affine': jnp.stack([ones, zeros, zeros, ones,
                                           b_re - b_im, b_re + b_im], axis=0)}
    return params


def _fold_tap_block(wr_t, wi_t, aff):
    """Per-tap (2*Cin, 2*Cout) weight block: rows = [real-in | imag-in] channels, cols =
    [real-out | imag-out]; complex structure and the per-channel complex affine folded in
    (all in f32; bf16 cast happens once at the end of prepare_params)."""
    arr, ari, air, aii = aff[0], aff[1], aff[2], aff[3]
    top = jnp.concatenate([wr_t * arr + wi_t * ari, wr_t * air + wi_t * aii], axis=1)
    bot = jnp.concatenate([wr_t * ari - wi_t * arr, wr_t * aii - wi_t * air], axis=1)
    return jnp.concatenate([top, bot], axis=0)


def prepare_params(params, cfg):
    """One-time hoisted weight prep: conv weights -> (P, K, 2*Cout) matmul matrices with the
    BN / bias affine folded into the columns; complex biases kept separate in f32."""
    prepared = {'encoders': [], 'decoders': []}
    for lp, (cin, cout, k, s, p) in zip(params['encoders'], cfg['encoders']):
        aff = lp['affine']
        blocks = []
        for i in range(k[0]):
            for j in range(k[1]):
                blocks.append(_fold_tap_block(lp['wr'][:, :, i, j].T,
                                              lp['wi'][:, :, i, j].T, aff))
        B = jnp.concatenate(blocks, axis=0).astype(jnp.bfloat16)[None]   # (1, kh*kw*2cin, 2cout)
        bias = jnp.concatenate([aff[4], aff[5]])[None, :]                # (1, 2cout) f32
        prepared['encoders'].append({'B': B, 'bias': bias})

    dec_params = params['decoders'] + [params['last']]
    for lp, (cin, cout, k, s, p) in zip(dec_params, cfg['decoders']):
        aff = lp['affine']
        plan = conv_transpose_phase_plan(k[0], k[1], s[0], s[1], p[0], p[1])
        kmax = max(1, max(len(ph['taps_h']) * len(ph['taps_w']) for ph in plan))
        Bs = []
        for ph in plan:
            blocks = []
            for kih, _ in ph['taps_h']:
                for kiw, _ in ph['taps_w']:
                    blocks.append(_fold_tap_block(lp['wr'][:, :, kih, kiw],
                                                  lp['wi'][:, :, kih, kiw], aff))
            kt = len(blocks)
            if kt < kmax:
                blocks.append(jnp.zeros(((kmax - kt) * 2 * cin, 2 * cout), jnp.float32))
            Bs.append(jnp.concatenate(blocks, axis=0))
        B = jnp.stack(Bs, axis=0).astype(jnp.bfloat16)                   # (P, kmax*2cin, 2cout)
        bias = jnp.concatenate([aff[4], aff[5]])[None, :]
        prepared['decoders'].append({'B': B, 'bias': bias})
    return prepared


# ------------------------------- U-Net forward ------------------------------

def unet_forward(prepared, cfg, xr_nchw, xi_nchw):
    slope = cfg['leaky_slope']
    xr = jnp.transpose(xr_nchw, (0, 2, 3, 1))
    xi = jnp.transpose(xi_nchw, (0, 2, 3, 1))
    in_cat = jnp.concatenate([xr, xi], axis=-1)          # (N, H, W, 2) packed [real | imag]

    z = in_cat
    skips = []
    for lp, (cin, cout, k, s, p) in zip(prepared['encoders'], cfg['encoders']):
        z = complex_conv2d(z, lp, k, s, p, slope)
        skips.append((z, cout))
    cur_cout = cfg['encoders'][-1][1]

    skip = skips.pop()
    skip = None                                          # faithful: deepest skip is discarded
    for lp, (cin, cout, k, s, p) in zip(prepared['decoders'][:-1], cfg['decoders'][:-1]):
        if skip is not None:
            z = padded_cat_packed(z, skip[0], cur_cout, skip[1])
        z = complex_conv_transpose2d(z, lp, k, s, p, slope, jnp.bfloat16)
        cur_cout = cout
        skip = skips.pop()

    z = padded_cat_packed(z, skip[0], cur_cout, skip[1])
    cin, cout, k, s, p = cfg['decoders'][-1]
    # Last decoder: complex ConvTranspose2d with bias, no BN, no activation (slope=1.0), f32 out.
    z = complex_conv_transpose2d(z, prepared['decoders'][-1], k, s, p, 1.0, jnp.float32)

    z = pad2d_as_nhwc(z, in_cat)                         # (N, H, W, 2)

    if cfg['ratio_mask'] == 'BDSS':
        # Mask applied in NHWC (input NHWC already exists); single NCHW transpose at the end.
        y = ratio_mask_bdss(z, in_cat)
        yr = jnp.transpose(y[..., 0:1], (0, 3, 1, 2))
        yi = jnp.transpose(y[..., 1:2], (0, 3, 1, 2))
        return yr, yi
    # TODO(synk): 'BDT' / 'E' magnitude-phase ratio-mask variants not implemented; cfg uses 'BDSS'.
    raise NotImplementedError(cfg['ratio_mask'])


# ---------------------------------- main -------------------------------------

if __name__ == "__main__":
    cfg = {
        'encoders': [
            (1, 8, (3, 3), (2, 2), (1, 1)),
            (8, 16, (3, 3), (2, 2), (1, 1)),
            (16, 32, (3, 3), (2, 2), (1, 1)),
        ],
        'decoders': [
            (32, 16, (3, 3), (2, 2), (1, 1)),
            (32, 8, (3, 3), (2, 2), (1, 1)),
            (16, 1, (3, 3), (2, 2), (1, 1)),
        ],
        'leaky_slope': 0.1,
        'ratio_mask': 'BDSS',
    }
    key = jax.random.PRNGKey(0)
    kxr, kxi, kp = jax.random.split(key, 3)
    xr = jax.random.normal(kxr, (2, 1, 16, 16), jnp.float32)
    xi = jax.random.normal(kxi, (2, 1, 16, 16), jnp.float32)
    params = init_params(kp, cfg)
    prepared = prepare_params(params, cfg)   # hoisted, runs once off the forward path

    fwd = jax.jit(lambda p, a, b: unet_forward(p, cfg, a, b))
    yr, yi = fwd(prepared, xr, xi)
    jax.block_until_ready((yr, yi))

    assert yr.shape == xr.shape and yi.shape == xi.shape
    assert bool(jnp.all(jnp.isfinite(yr))) and bool(jnp.all(jnp.isfinite(yi)))
    print("KERNEL_OK")
</pallas_src>

<mosaic_0001>
module attributes {stable_mosaic.version = 11 : i64} {
  func.func @_mm_bias_act_kernel(%arg0: i32, %arg1: i32, %arg2: memref<1x128x18xbf16, #tpu.memory_space<vmem>>, %arg3: memref<1x18x16xbf16, #tpu.memory_space<vmem>>, %arg4: memref<1x16xf32, #tpu.memory_space<vmem>>, %arg5: memref<1x128x16xbf16, #tpu.memory_space<vmem>>) attributes {dimension_semantics = [#tpu.dimension_semantics<parallel>, #tpu.dimension_semantics<parallel>], iteration_bounds = array<i64: 1, 1>, scalar_prefetch = 0 : i64, scratch_operands = 0 : i64, tpu.core_type = #tpu.core_type<tc>, window_params = [{transform_indices = @transform_0, window_bounds = array<i64: 1, 128, 18>}, {transform_indices = @transform_1, window_bounds = array<i64: 1, 18, 16>}, {pipeline_mode = #tpu.pipeline_mode<synchronous>, transform_indices = @transform_2, window_bounds = array<i64: 1, 16>}, {transform_indices = @transform_3, window_bounds = array<i64: 1, 128, 16>}]} {
    %c0 = arith.constant 0 : index
    %c0_0 = arith.constant 0 : index
    %c0_1 = arith.constant 0 : index
    %0 = vector.load %arg2[%c0, %c0_0, %c0_1] : memref<1x128x18xbf16, #tpu.memory_space<vmem>>, vector<1x128x18xbf16>
    %1 = vector.shape_cast %0 : vector<1x128x18xbf16> to vector<128x18xbf16>
    %c0_2 = arith.constant 0 : index
    %c0_3 = arith.constant 0 : index
    %c0_4 = arith.constant 0 : index
    %2 = vector.load %arg3[%c0_2, %c0_3, %c0_4] : memref<1x18x16xbf16, #tpu.memory_space<vmem>>, vector<1x18x16xbf16>
    %3 = vector.shape_cast %2 : vector<1x18x16xbf16> to vector<18x16xbf16>
    %cst = arith.constant dense<0.000000e+00> : vector<128x16xf32>
    %4 = tpu.matmul %1, %3, %cst {dimension_numbers = #tpu.dot_dimension_numbers<[1], [0], [0], [1], [0, 0, 1, 1], [], []>} : vector<128x18xbf16>, vector<18x16xbf16>, vector<128x16xf32> -> vector<128x16xf32>
    %c0_5 = arith.constant 0 : index
    %c0_6 = arith.constant 0 : index
    %5 = vector.load %arg4[%c0_5, %c0_6] : memref<1x16xf32, #tpu.memory_space<vmem>>, vector<1x16xf32>
    %6 = vector.broadcast %5 : vector<1x16xf32> to vector<128x16xf32>
    %7 = arith.addf %4, %6 : vector<128x16xf32>
    %cst_7 = arith.constant 0.000000e+00 : f32
    %8 = vector.broadcast %cst_7 : f32 to vector<128x16xf32>
    %9 = arith.cmpf oge, %7, %8 : vector<128x16xf32>
    %cst_8 = arith.constant 1.000000e-01 : f32
    %10 = vector.broadcast %cst_8 : f32 to vector<128x16xf32>
    %11 = arith.mulf %10, %7 : vector<128x16xf32>
    %12 = arith.select %9, %7, %11 : vector<128x16xi1>, vector<128x16xf32>
    %13 = arith.truncf %12 : vector<128x16xf32> to vector<128x16xbf16>
    %c0_9 = arith.constant 0 : index
    %c0_10 = arith.constant 0 : index
    %c0_11 = arith.constant 0 : index
    %14 = vector.load %arg5[%c0_9, %c0_10, %c0_11] : memref<1x128x16xbf16, #tpu.memory_space<vmem>>, vector<1x128x16xbf16>
    %15 = vector.shape_cast %14 : vector<1x128x16xbf16> to vector<128x16xbf16>
    %16 = vector.shape_cast %13 : vector<128x16xbf16> to vector<1x128x16xbf16>
    tpu.vector_store %arg5[%c0_9, %c0_10, %c0_11], %16 {strides = array<i32>} : memref<1x128x16xbf16, #tpu.memory_space<vmem>>, vector<1x128x16xbf16>,
    return
  }
  func.func @transform_0(%arg0: i32, %arg1: i32) -> (i32, i32, i32) {
    %c0_i32 = arith.constant 0 : i32
    %c0_i32_0 = arith.constant 0 : i32
    return %arg0, %arg1, %c0_i32 : i32, i32, i32
  }
  func.func @transform_1(%arg0: i32, %arg1: i32) -> (i32, i32, i32) {
    %c0_i32 = arith.constant 0 : i32
    %c0_i32_0 = arith.constant 0 : i32
    %c0_i32_1 = arith.constant 0 : i32
    return %arg0, %c0_i32, %c0_i32_0 : i32, i32, i32
  }
  func.func @transform_2(%arg0: i32, %arg1: i32) -> (i32, i32) {
    %c0_i32 = arith.constant 0 : i32
    %c0_i32_0 = arith.constant 0 : i32
    %c0_i32_1 = arith.constant 0 : i32
    return %c0_i32, %c0_i32_0 : i32, i32
  }
  func.func @transform_3(%arg0: i32, %arg1: i32) -> (i32, i32, i32) {
    %c0_i32 = arith.constant 0 : i32
    %c0_i32_0 = arith.constant 0 : i32
    return %arg0, %arg1, %c0_i32 : i32, i32, i32
  }
}

module attributes {stable_mosaic.version = 11 : i64} {
  func.func @_mm_bias_act_kernel(%arg0: i32, %arg1: i32, %arg2: memref<1x32x144xbf16, #tpu.memory_space<vmem>>, %arg3: memref<1x144x32xbf16, #tpu.memory_space<vmem>>, %arg4: memref<1x32xf32, #tpu.memory_space<vmem>>, %arg5: memref<1x32x32xbf16, #tpu.memory_space<vmem>>) attributes {dimension_semantics = [#tpu.dimension_semantics<parallel>, #tpu.dimension_semantics<parallel>], iteration_bounds = array<i64: 1, 1>, scalar_prefetch = 0 : i64, scratch_operands = 0 : i64, tpu.core_type = #tpu.core_type<tc>, window_params = [{transform_indices = @transform_0, window_bounds = array<i64: 1, 32, 144>}, {transform_indices = @transform_1, window_bounds = array<i64: 1, 144, 32>}, {pipeline_mode = #tpu.pipeline_mode<synchronous>, transform_indices = @transform_2, window_bounds = array<i64: 1, 32>}, {transform_indices = @transform_3, window_bounds = array<i64: 1, 32, 32>}]} {
    %c0 = arith.constant 0 : index
    %c0_0 = arith.constant 0 : index
    %c0_1 = arith.constant 0 : index
    %0 = vector.load %arg2[%c0, %c0_0, %c0_1] : memref<1x32x144xbf16, #tpu.memory_space<vmem>>, vector<1x32x144xbf16>
    %1 = vector.shape_cast %0 : vector<1x32x144xbf16> to vector<32x144xbf16>
    %c0_2 = arith.constant 0 : index
    %c0_3 = arith.constant 0 : index
    %c0_4 = arith.constant 0 : index
    %2 = vector.load %arg3[%c0_2, %c0_3, %c0_4] : memref<1x144x32xbf16, #tpu.memory_space<vmem>>, vector<1x144x32xbf16>
    %3 = vector.shape_cast %2 : vector<1x144x32xbf16> to vector<144x32xbf16>
    %cst = arith.constant dense<0.000000e+00> : vector<32x32xf32>
    %4 = tpu.matmul %1, %3, %cst {dimension_numbers = #tpu.dot_dimension_numbers<[1], [0], [0], [1], [0, 0, 1, 1], [], []>} : vector<32x144xbf16>, vector<144x32xbf16>, vector<32x32xf32> -> vector<32x32xf32>
    %c0_5 = arith.constant 0 : index
    %c0_6 = arith.constant 0 : index
    %5 = vector.load %arg4[%c0_5, %c0_6] : memref<1x32xf32, #tpu.memory_space<vmem>>, vector<1x32xf32>
    %6 = vector.broadcast %5 : vector<1x32xf32> to vector<32x32xf32>
    %7 = arith.addf %4, %6 : vector<32x32xf32>
    %cst_7 = arith.constant 0.000000e+00 : f32
    %8 = vector.broadcast %cst_7 : f32 to vector<32x32xf32>
    %9 = arith.cmpf oge, %7, %8 : vector<32x32xf32>
    %cst_8 = arith.constant 1.000000e-01 : f32
    %10 = vector.broadcast %cst_8 : f32 to vector<32x32xf32>
    %11 = arith.mulf %10, %7 : vector<32x32xf32>
    %12 = arith.select %9, %7, %11 : vector<32x32xi1>, vector<32x32xf32>
    %13 = arith.truncf %12 : vector<32x32xf32> to vector<32x32xbf16>
    %c0_9 = arith.constant 0 : index
    %c0_10 = arith.constant 0 : index
    %c0_11 = arith.constant 0 : index
    %14 = vector.load %arg5[%c0_9, %c0_10, %c0_11] : memref<1x32x32xbf16, #tpu.memory_space<vmem>>, vector<1x32x32xbf16>
    %15 = vector.shape_cast %14 : vector<1x32x32xbf16> to vector<32x32xbf16>
    %16 = vector.shape_cast %13 : vector<32x32xbf16> to vector<1x32x32xbf16>
    tpu.vector_store %arg5[%c0_9, %c0_10, %c0_11], %16 {strides = array<i32>} : memref<1x32x32xbf16, #tpu.memory_space<vmem>>, vector<1x32x32xbf16>,
    return
  }
  func.func @transform_0(%arg0: i32, %arg1: i32) -> (i32, i32, i32) {
    %c0_i32 = arith.constant 0 : i32
    %c0_i32_0 = arith.constant 0 : i32
    return %arg0, %arg1, %c0_i32 : i32, i32, i32
  }
  func.func @transform_1(%arg0: i32, %arg1: i32) -> (i32, i32, i32) {
    %c0_i32 = arith.constant 0 : i32
    %c0_i32_0 = arith.constant 0 : i32
    %c0_i32_1 = arith.constant 0 : i32
    return %arg0, %c0_i32, %c0_i32_0 : i32, i32, i32
  }
  func.func @transform_2(%arg0: i32, %arg1: i32) -> (i32, i32) {
    %c0_i32 = arith.constant 0 : i32
    %c0_i32_0 = arith.constant 0 : i32
    %c0_i32_1 = arith.constant 0 : i32
    return %c0_i32, %c0_i32_0 : i32, i32
  }
  func.func @transform_3(%arg0: i32, %arg1: i32) -> (i32, i32, i32) {
    %c0_i32 = arith.constant 0 : i32
    %c0_i32_0 = arith.constant 0 : i32
    return %arg0, %arg1, %c0_i32 : i32, i32, i32
  }
}

module attributes {stable_mosaic.version = 11 : i64} {
  func.func @_mm_bias_act_kernel(%arg0: i32, %arg1: i32, %arg2: memref<1x16x288xbf16, #tpu.memory_space<vmem>>, %arg3: memref<1x288x64xbf16, #tpu.memory_space<vmem>>, %arg4: memref<1x64xf32, #tpu.memory_space<vmem>>, %arg5: memref<1x16x64xbf16, #tpu.memory_space<vmem>>) attributes {dimension_semantics = [#tpu.dimension_semantics<parallel>, #tpu.dimension_semantics<parallel>], iteration_bounds = array<i64: 1, 1>, scalar_prefetch = 0 : i64, scratch_operands = 0 : i64, tpu.core_type = #tpu.core_type<tc>, window_params = [{transform_indices = @transform_0, window_bounds = array<i64: 1, 16, 288>}, {transform_indices = @transform_1, window_bounds = array<i64: 1, 288, 64>}, {pipeline_mode = #tpu.pipeline_mode<synchronous>, transform_indices = @transform_2, window_bounds = array<i64: 1, 64>}, {transform_indices = @transform_3, window_bounds = array<i64: 1, 16, 64>}]} {
    %c0 = arith.constant 0 : index
    %c0_0 = arith.constant 0 : index
    %c0_1 = arith.constant 0 : index
    %0 = vector.load %arg2[%c0, %c0_0, %c0_1] : memref<1x16x288xbf16, #tpu.memory_space<vmem>>, vector<1x16x288xbf16>
    %1 = vector.shape_cast %0 : vector<1x16x288xbf16> to vector<16x288xbf16>
    %c0_2 = arith.constant 0 : index
    %c0_3 = arith.constant 0 : index
    %c0_4 = arith.constant 0 : index
    %2 = vector.load %arg3[%c0_2, %c0_3, %c0_4] : memref<1x288x64xbf16, #tpu.memory_space<vmem>>, vector<1x288x64xbf16>
    %3 = vector.shape_cast %2 : vector<1x288x64xbf16> to vector<288x64xbf16>
    %cst = arith.constant dense<0.000000e+00> : vector<16x64xf32>
    %4 = tpu.matmul %1, %3, %cst {dimension_numbers = #tpu.dot_dimension_numbers<[1], [0], [0], [1], [0, 0, 1, 1], [], []>} : vector<16x288xbf16>, vector<288x64xbf16>, vector<16x64xf32> -> vector<16x64xf32>
    %c0_5 = arith.constant 0 : index
    %c0_6 = arith.constant 0 : index
    %5 = vector.load %arg4[%c0_5, %c0_6] : memref<1x64xf32, #tpu.memory_space<vmem>>, vector<1x64xf32>
    %6 = vector.broadcast %5 : vector<1x64xf32> to vector<16x64xf32>
    %7 = arith.addf %4, %6 : vector<16x64xf32>
    %cst_7 = arith.constant 0.000000e+00 : f32
    %8 = vector.broadcast %cst_7 : f32 to vector<16x64xf32>
    %9 = arith.cmpf oge, %7, %8 : vector<16x64xf32>
    %cst_8 = arith.constant 1.000000e-01 : f32
    %10 = vector.broadcast %cst_8 : f32 to vector<16x64xf32>
    %11 = arith.mulf %10, %7 : vector<16x64xf32>
    %12 = arith.select %9, %7, %11 : vector<16x64xi1>, vector<16x64xf32>
    %13 = arith.truncf %12 : vector<16x64xf32> to vector<16x64xbf16>
    %c0_9 = arith.constant 0 : index
    %c0_10 = arith.constant 0 : index
    %c0_11 = arith.constant 0 : index
    %14 = vector.load %arg5[%c0_9, %c0_10, %c0_11] : memref<1x16x64xbf16, #tpu.memory_space<vmem>>, vector<1x16x64xbf16>
    %15 = vector.shape_cast %14 : vector<1x16x64xbf16> to vector<16x64xbf16>
    %16 = vector.shape_cast %13 : vector<16x64xbf16> to vector<1x16x64xbf16>
    tpu.vector_store %arg5[%c0_9, %c0_10, %c0_11], %16 {strides = array<i32>} : memref<1x16x64xbf16, #tpu.memory_space<vmem>>, vector<1x16x64xbf16>,
    return
  }
  func.func @transform_0(%arg0: i32, %arg1: i32) -> (i32, i32, i32) {
    %c0_i32 = arith.constant 0 : i32
    %c0_i32_0 = arith.constant 0 : i32
    return %arg0, %arg1, %c0_i32 : i32, i32, i32
  }
  func.func @transform_1(%arg0: i32, %arg1: i32) -> (i32, i32, i32) {
    %c0_i32 = arith.constant 0 : i32
    %c0_i32_0 = arith.constant 0 : i32
    %c0_i32_1 = arith.constant 0 : i32
    return %arg0, %c0_i32, %c0_i32_0 : i32, i32, i32
  }
  func.func @transform_2(%arg0: i32, %arg1: i32) -> (i32, i32) {
    %c0_i32 = arith.constant 0 : i32
    %c0_i32_0 = arith.constant 0 : i32
    %c0_i32_1 = arith.constant 0 : i32
    return %c0_i32, %c0_i32_0 : i32, i32
  }
  func.func @transform_3(%arg0: i32, %arg1: i32) -> (i32, i32, i32) {
    %c0_i32 = arith.constant 0 : i32
    %c0_i32_0 = arith.constant 0 : i32
    return %arg0, %arg1, %c0_i32 : i32, i32, i32
  }
}

module attributes {stable_mosaic.version = 11 : i64} {
  func.func @_mm_bias_act_kernel(%arg0: i32, %arg1: i32, %arg2: memref<1x16x256xbf16, #tpu.memory_space<vmem>>, %arg3: memref<1x256x32xbf16, #tpu.memory_space<vmem>>, %arg4: memref<1x32xf32, #tpu.memory_space<vmem>>, %arg5: memref<1x16x32xbf16, #tpu.memory_space<vmem>>) attributes {dimension_semantics = [#tpu.dimension_semantics<parallel>, #tpu.dimension_semantics<parallel>], iteration_bounds = array<i64: 4, 1>, scalar_prefetch = 0 : i64, scratch_operands = 0 : i64, tpu.core_type = #tpu.core_type<tc>, window_params = [{transform_indices = @transform_0, window_bounds = array<i64: 1, 16, 256>}, {transform_indices = @transform_1, window_bounds = array<i64: 1, 256, 32>}, {pipeline_mode = #tpu.pipeline_mode<synchronous>, transform_indices = @transform_2, window_bounds = array<i64: 1, 32>}, {transform_indices = @transform_3, window_bounds = array<i64: 1, 16, 32>}]} {
    %c0 = arith.constant 0 : index
    %c0_0 = arith.constant 0 : index
    %c0_1 = arith.constant 0 : index
    %0 = vector.load %arg2[%c0, %c0_0, %c0_1] : memref<1x16x256xbf16, #tpu.memory_space<vmem>>, vector<1x16x256xbf16>
    %1 = vector.shape_cast %0 : vector<1x16x256xbf16> to vector<16x256xbf16>
    %c0_2 = arith.constant 0 : index
    %c0_3 = arith.constant 0 : index
    %c0_4 = arith.constant 0 : index
    %2 = vector.load %arg3[%c0_2, %c0_3, %c0_4] : memref<1x256x32xbf16, #tpu.memory_space<vmem>>, vector<1x256x32xbf16>
    %3 = vector.shape_cast %2 : vector<1x256x32xbf16> to vector<256x32xbf16>
    %cst = arith.constant dense<0.000000e+00> : vector<16x32xf32>
    %4 = tpu.matmul %1, %3, %cst {dimension_numbers = #tpu.dot_dimension_numbers<[1], [0], [0], [1], [0, 0, 1, 1], [], []>} : vector<16x256xbf16>, vector<256x32xbf16>, vector<16x32xf32> -> vector<16x32xf32>
    %c0_5 = arith.constant 0 : index
    %c0_6 = arith.constant 0 : index
    %5 = vector.load %arg4[%c0_5, %c0_6] : memref<1x32xf32, #tpu.memory_space<vmem>>, vector<1x32xf32>
    %6 = vector.broadcast %5 : vector<1x32xf32> to vector<16x32xf32>
    %7 = arith.addf %4, %6 : vector<16x32xf32>
    %cst_7 = arith.constant 0.000000e+00 : f32
    %8 = vector.broadcast %cst_7 : f32 to vector<16x32xf32>
    %9 = arith.cmpf oge, %7, %8 : vector<16x32xf32>
    %cst_8 = arith.constant 1.000000e-01 : f32
    %10 = vector.broadcast %cst_8 : f32 to vector<16x32xf32>
    %11 = arith.mulf %10, %7 : vector<16x32xf32>
    %12 = arith.select %9, %7, %11 : vector<16x32xi1>, vector<16x32xf32>
    %13 = arith.truncf %12 : vector<16x32xf32> to vector<16x32xbf16>
    %c0_9 = arith.constant 0 : index
    %c0_10 = arith.constant 0 : index
    %c0_11 = arith.constant 0 : index
    %14 = vector.load %arg5[%c0_9, %c0_10, %c0_11] : memref<1x16x32xbf16, #tpu.memory_space<vmem>>, vector<1x16x32xbf16>
    %15 = vector.shape_cast %14 : vector<1x16x32xbf16> to vector<16x32xbf16>
    %16 = vector.shape_cast %13 : vector<16x32xbf16> to vector<1x16x32xbf16>
    tpu.vector_store %arg5[%c0_9, %c0_10, %c0_11], %16 {strides = array<i32>} : memref<1x16x32xbf16, #tpu.memory_space<vmem>>, vector<1x16x32xbf16>,
    return
  }
  func.func @transform_0(%arg0: i32, %arg1: i32) -> (i32, i32, i32) {
    %c0_i32 = arith.constant 0 : i32
    %c0_i32_0 = arith.constant 0 : i32
    return %arg0, %arg1, %c0_i32 : i32, i32, i32
  }
  func.func @transform_1(%arg0: i32, %arg1: i32) -> (i32, i32, i32) {
    %c0_i32 = arith.constant 0 : i32
    %c0_i32_0 = arith.constant 0 : i32
    %c0_i32_1 = arith.constant 0 : i32
    return %arg0, %c0_i32, %c0_i32_0 : i32, i32, i32
  }
  func.func @transform_2(%arg0: i32, %arg1: i32) -> (i32, i32) {
    %c0_i32 = arith.constant 0 : i32
    %c0_i32_0 = arith.constant 0 : i32
    %c0_i32_1 = arith.constant 0 : i32
    return %c0_i32, %c0_i32_0 : i32, i32
  }
  func.func @transform_3(%arg0: i32, %arg1: i32) -> (i32, i32, i32) {
    %c0_i32 = arith.constant 0 : i32
    %c0_i32_0 = arith.constant 0 : i32
    return %arg0, %arg1, %c0_i32 : i32, i32, i32
  }
}

module attributes {stable_mosaic.version = 11 : i64} {
  func.func @_mm_bias_act_kernel(%arg0: i32, %arg1: i32, %arg2: memref<1x32x256xbf16, #tpu.memory_space<vmem>>, %arg3: memref<1x256x16xbf16, #tpu.memory_space<vmem>>, %arg4: memref<1x16xf32, #tpu.memory_space<vmem>>, %arg5: memref<1x32x16xbf16, #tpu.memory_space<vmem>>) attributes {dimension_semantics = [#tpu.dimension_semantics<parallel>, #tpu.dimension_semantics<parallel>], iteration_bounds = array<i64: 4, 1>, scalar_prefetch = 0 : i64, scratch_operands = 0 : i64, tpu.core_type = #tpu.core_type<tc>, window_params = [{transform_indices = @transform_0, window_bounds = array<i64: 1, 32, 256>}, {transform_indices = @transform_1, window_bounds = array<i64: 1, 256, 16>}, {pipeline_mode = #tpu.pipeline_mode<synchronous>, transform_indices = @transform_2, window_bounds = array<i64: 1, 16>}, {transform_indices = @transform_3, window_bounds = array<i64: 1, 32, 16>}]} {
    %c0 = arith.constant 0 : index
    %c0_0 = arith.constant 0 : index
    %c0_1 = arith.constant 0 : index
    %0 = vector.load %arg2[%c0, %c0_0, %c0_1] : memref<1x32x256xbf16, #tpu.memory_space<vmem>>, vector<1x32x256xbf16>
    %1 = vector.shape_cast %0 : vector<1x32x256xbf16> to vector<32x256xbf16>
    %c0_2 = arith.constant 0 : index
    %c0_3 = arith.constant 0 : index
    %c0_4 = arith.constant 0 : index
    %2 = vector.load %arg3[%c0_2, %c0_3, %c0_4] : memref<1x256x16xbf16, #tpu.memory_space<vmem>>, vector<1x256x16xbf16>
    %3 = vector.shape_cast %2 : vector<1x256x16xbf16> to vector<256x16xbf16>
    %cst = arith.constant dense<0.000000e+00> : vector<32x16xf32>
    %4 = tpu.matmul %1, %3, %cst {dimension_numbers = #tpu.dot_dimension_numbers<[1], [0], [0], [1], [0, 0, 1, 1], [], []>} : vector<32x256xbf16>, vector<256x16xbf16>, vector<32x16xf32> -> vector<32x16xf32>
    %c0_5 = arith.constant 0 : index
    %c0_6 = arith.constant 0 : index
    %5 = vector.load %arg4[%c0_5, %c0_6] : memref<1x16xf32, #tpu.memory_space<vmem>>, vector<1x16xf32>
    %6 = vector.broadcast %5 : vector<1x16xf32> to vector<32x16xf32>
    %7 = arith.addf %4, %6 : vector<32x16xf32>
    %cst_7 = arith.constant 0.000000e+00 : f32
    %8 = vector.broadcast %cst_7 : f32 to vector<32x16xf32>
    %9 = arith.cmpf oge, %7, %8 : vector<32x16xf32>
    %cst_8 = arith.constant 1.000000e-01 : f32
    %10 = vector.broadcast %cst_8 : f32 to vector<32x16xf32>
    %11 = arith.mulf %10, %7 : vector<32x16xf32>
    %12 = arith.select %9, %7, %11 : vector<32x16xi1>, vector<32x16xf32>
    %13 = arith.truncf %12 : vector<32x16xf32> to vector<32x16xbf16>
    %c0_9 = arith.constant 0 : index
    %c0_10 = arith.constant 0 : index
    %c0_11 = arith.constant 0 : index
    %14 = vector.load %arg5[%c0_9, %c0_10, %c0_11] : memref<1x32x16xbf16, #tpu.memory_space<vmem>>, vector<1x32x16xbf16>
    %15 = vector.shape_cast %14 : vector<1x32x16xbf16> to vector<32x16xbf16>
    %16 = vector.shape_cast %13 : vector<32x16xbf16> to vector<1x32x16xbf16>
    tpu.vector_store %arg5[%c0_9, %c0_10, %c0_11], %16 {strides = array<i32>} : memref<1x32x16xbf16, #tpu.memory_space<vmem>>, vector<1x32x16xbf16>,
    return
  }
  func.func @transform_0(%arg0: i32, %arg1: i32) -> (i32, i32, i32) {
    %c0_i32 = arith.constant 0 : i32
    %c0_i32_0 = arith.constant 0 : i32
    return %arg0, %arg1, %c0_i32 : i32, i32, i32
  }
  func.func @transform_1(%arg0: i32, %arg1: i32) -> (i32, i32, i32) {
    %c0_i32 = arith.constant 0 : i32
    %c0_i32_0 = arith.constant 0 : i32
    %c0_i32_1 = arith.constant 0 : i32
    return %arg0, %c0_i32, %c0_i32_0 : i32, i32, i32
  }
  func.func @transform_2(%arg0: i32, %arg1: i32) -> (i32, i32) {
    %c0_i32 = arith.constant 0 : i32
    %c0_i32_0 = arith.constant 0 : i32
    %c0_i32_1 = arith.constant 0 : i32
    return %c0_i32, %c0_i32_0 : i32, i32
  }
  func.func @transform_3(%arg0: i32, %arg1: i32) -> (i32, i32, i32) {
    %c0_i32 = arith.constant 0 : i32
    %c0_i32_0 = arith.constant 0 : i32
    return %arg0, %arg1, %c0_i32 : i32, i32, i32
  }
}

module attributes {stable_mosaic.version = 11 : i64} {
  func.func @_mm_bias_act_kernel(%arg0: i32, %arg1: i32, %arg2: memref<1x128x128xbf16, #tpu.memory_space<vmem>>, %arg3: memref<1x128x2xbf16, #tpu.memory_space<vmem>>, %arg4: memref<1x2xf32, #tpu.memory_space<vmem>>, %arg5: memref<1x128x2xf32, #tpu.memory_space<vmem>>) attributes {dimension_semantics = [#tpu.dimension_semantics<parallel>, #tpu.dimension_semantics<parallel>], iteration_bounds = array<i64: 4, 1>, scalar_prefetch = 0 : i64, scratch_operands = 0 : i64, tpu.core_type = #tpu.core_type<tc>, window_params = [{transform_indices = @transform_0, window_bounds = array<i64: 1, 128, 128>}, {transform_indices = @transform_1, window_bounds = array<i64: 1, 128, 2>}, {pipeline_mode = #tpu.pipeline_mode<synchronous>, transform_indices = @transform_2, window_bounds = array<i64: 1, 2>}, {transform_indices = @transform_3, window_bounds = array<i64: 1, 128, 2>}]} {
    %c0 = arith.constant 0 : index
    %c0_0 = arith.constant 0 : index
    %c0_1 = arith.constant 0 : index
    %0 = vector.load %arg2[%c0, %c0_0, %c0_1] : memref<1x128x128xbf16, #tpu.memory_space<vmem>>, vector<1x128x128xbf16>
    %1 = vector.shape_cast %0 : vector<1x128x128xbf16> to vector<128x128xbf16>
    %c0_2 = arith.constant 0 : index
    %c0_3 = arith.constant 0 : index
    %c0_4 = arith.constant 0 : index
    %2 = vector.load %arg3[%c0_2, %c0_3, %c0_4] : memref<1x128x2xbf16, #tpu.memory_space<vmem>>, vector<1x128x2xbf16>
    %3 = vector.shape_cast %2 : vector<1x128x2xbf16> to vector<128x2xbf16>
    %cst = arith.constant dense<0.000000e+00> : vector<128x2xf32>
    %4 = tpu.matmul %1, %3, %cst {dimension_numbers = #tpu.dot_dimension_numbers<[1], [0], [0], [1], [0, 0, 1, 1], [], []>} : vector<128x128xbf16>, vector<128x2xbf16>, vector<128x2xf32> -> vector<128x2xf32>
    %c0_5 = arith.constant 0 : index
    %c0_6 = arith.constant 0 : index
    %5 = vector.load %arg4[%c0_5, %c0_6] : memref<1x2xf32, #tpu.memory_space<vmem>>, vector<1x2xf32>
    %6 = vector.broadcast %5 : vector<1x2xf32> to vector<128x2xf32>
    %7 = arith.addf %4, %6 : vector<128x2xf32>
    %c0_7 = arith.constant 0 : index
    %c0_8 = arith.constant 0 : index
    %c0_9 = arith.constant 0 : index
    %8 = vector.load %arg5[%c0_7, %c0_8, %c0_9] : memref<1x128x2xf32, #tpu.memory_space<vmem>>, vector<1x128x2xf32>
    %9 = vector.shape_cast %8 : vector<1x128x2xf32> to vector<128x2xf32>
    %10 = vector.shape_cast %7 : vector<128x2xf32> to vector<1x128x2xf32>
    tpu.vector_store %arg5[%c0_7, %c0_8, %c0_9], %10 {strides = array<i32>} : memref<1x128x2xf32, #tpu.memory_space<vmem>>, vector<1x128x2xf32>,
    return
  }
  func.func @transform_0(%arg0: i32, %arg1: i32) -> (i32, i32, i32) {
    %c0_i32 = arith.constant 0 : i32
    %c0_i32_0 = arith.constant 0 : i32
    return %arg0, %arg1, %c0_i32 : i32, i32, i32
  }
  func.func @transform_1(%arg0: i32, %arg1: i32) -> (i32, i32, i32) {
    %c0_i32 = arith.constant 0 : i32
    %c0_i32_0 = arith.constant 0 : i32
    %c0_i32_1 = arith.constant 0 : i32
    return %arg0, %c0_i32, %c0_i32_0 : i32, i32, i32
  }
  func.func @transform_2(%arg0: i32, %arg1: i32) -> (i32, i32) {
    %c0_i32 = arith.constant 0 : i32
    %c0_i32_0 = arith.constant 0 : i32
    %c0_i32_1 = arith.constant 0 : i32
    return %c0_i32, %c0_i32_0 : i32, i32
  }
  func.func @transform_3(%arg0: i32, %arg1: i32) -> (i32, i32, i32) {
    %c0_i32 = arith.constant 0 : i32
    %c0_i32_0 = arith.constant 0 : i32
    return %arg0, %arg1, %c0_i32 : i32, i32, i32
  }
}

module attributes {stable_mosaic.version = 11 : i64} {
  func.func @_ratio_mask_kernel(%arg0: i32, %arg1: memref<8x512xf32, #tpu.memory_space<vmem>>, %arg2: memref<8x512xf32, #tpu.memory_space<vmem>>, %arg3: memref<8x512xf32, #tpu.memory_space<vmem>>) attributes {dimension_semantics = [#tpu.dimension_semantics<parallel>], iteration_bounds = array<i64: 1>, scalar_prefetch = 0 : i64, scratch_operands = 0 : i64, tpu.core_type = #tpu.core_type<tc>, window_params = [{transform_indices = @transform_0, window_bounds = array<i64: 8, 512>}, {transform_indices = @transform_1, window_bounds = array<i64: 8, 512>}, {transform_indices = @transform_2, window_bounds = array<i64: 8, 512>}]} {
    %c0 = arith.constant 0 : index
    %c0_0 = arith.constant 0 : index
    %0 = vector.load %arg1[%c0, %c0_0] : memref<8x512xf32, #tpu.memory_space<vmem>>, vector<8x512xf32>
    %cst = arith.constant 5.000000e-01 : f32
    %1 = vector.broadcast %cst : f32 to vector<8x512xf32>
    %2 = arith.mulf %1, %0 : vector<8x512xf32>
    %3 = math.tanh %2 : vector<8x512xf32>
    %cst_1 = arith.constant 5.000000e-01 : f32
    %4 = vector.broadcast %cst_1 : f32 to vector<8x512xf32>
    %5 = arith.mulf %4, %3 : vector<8x512xf32>
    %cst_2 = arith.constant 5.000000e-01 : f32
    %6 = vector.broadcast %cst_2 : f32 to vector<8x512xf32>
    %7 = arith.addf %5, %6 : vector<8x512xf32>
    %c0_3 = arith.constant 0 : index
    %c0_4 = arith.constant 0 : index
    %8 = vector.load %arg2[%c0_3, %c0_4] : memref<8x512xf32, #tpu.memory_space<vmem>>, vector<8x512xf32>
    %9 = arith.mulf %7, %8 : vector<8x512xf32>
    %c0_5 = arith.constant 0 : index
    %c0_6 = arith.constant 0 : index
    %10 = vector.load %arg3[%c0_5, %c0_6] : memref<8x512xf32, #tpu.memory_space<vmem>>, vector<8x512xf32>
    tpu.vector_store %arg3[%c0_5, %c0_6], %9 {strides = array<i32>} : memref<8x512xf32, #tpu.memory_space<vmem>>, vector<8x512xf32>,
    return
  }
  func.func @transform_0(%arg0: i32) -> (i32, i32) {
    %c0_i32 = arith.constant 0 : i32
    %c0_i32_0 = arith.constant 0 : i32
    return %arg0, %c0_i32 : i32, i32
  }
  func.func @transform_1(%arg0: i32) -> (i32, i32) {
    %c0_i32 = arith.constant 0 : i32
    %c0_i32_0 = arith.constant 0 : i32
    return %arg0, %c0_i32 : i32, i32
  }
  func.func @transform_2(%arg0: i32) -> (i32, i32) {
    %c0_i32 = arith.constant 0 : i32
    %c0_i32_0 = arith.constant 0 : i32
    return %arg0, %c0_i32 : i32, i32
  }
}

</mosaic_0001>

<bundles_post_ra>
// kernel: _lambda_.7
= control target key start
LH: loop header
LB: loop body
LE: loop exit
PB: predicated region body
PF: predicated region fallthrough
CT: control target
= control target key end

     0   :  { %vm115_vm0 = vcmask 1040384   ;;  %vm90_vm1 = vcmask 146432   ;;  %vm328_vm2 = vcmask 125952   ;;  %s589_s1 = inlined_call_operand.vmem [shape: bf16[1,18,16], index: 1, kind: input, shape index: {}]   ;;  %s590_s0 = inlined_call_operand.vmem [shape: bf16[1,128,18], index: 0, kind: input, shape index: {}]   ;;  %s591_s2 = inlined_call_operand.vmem [shape: f32[1,16], index: 2, kind: input, shape index: {}]   ;;  %s592_s3 = inlined_call_operand.vmem [shape: bf16[1,128,16], index: 3, kind: output, shape index: {}]  }
   0x1   :  { %v436_v0 = vld [vmem:[%s589_s1] sm:$0xff]   ;;  %v437_v1 = vld [vmem:[%s589_s1 + $0x8] ss:$0 sps:$4 sm:$0x11]   ;;  %v442_v7 = vld [vmem:[%s590_s0 + $0x10] sm:$0xff]  }
   0x2   :  { %v438_v2 = vld [vmem:[%s590_s0] sm:$0xff]   ;;  %410 = vmatprep.subr.bf16.mxu0 %v436_v0  ;;  %430 = vmatprep.subr.bf16.mxu1 %v436_v0  ;;  %v117_v4 = vsel %vm115_vm0, %v437_v1, 0  ;;  %v440_v5 = vld [vmem:[%s590_s0 + $0x8] sm:$0xff]   ;;  %v443_v8 = vld [vmem:[%s590_s0 + $0x30] sm:$0xff]  }
   0x3   :  { %411 = vmatpush3.bf16.msra.mxu0 %v436_v0  ;;  %432 = vmatpush3.bf16.msra.mxu1 %v436_v0  ;;  %v439_v3 = vld [vmem:[%s590_s0 + $0x20] sm:$0xff]   ;;  %v441_v6 = vld [vmem:[%s590_s0 + $0x28] sm:$0xff]   ;;  %v444_v9 = vld [vmem:[%s590_s0 + $0x18] sm:$0xff]  }
   0x4   :  { %434 = vmatprep.subr.msk.bf16.mxu0 %vm115_vm0, %v437_v1  ;;  %435 = vmatprep.subr.msk.bf16.mxu1 %vm115_vm0, %v437_v1  ;;  %v445_v10 = vld [vmem:[%s590_s0 + $0x38] sm:$0xff]   ;;  %v507_v11 = vld [vmem:[%s591_s2] ss:$0 sm:$0xff] }
   0x5   :  { %414 = vmatprep.mubr.msk.bf16.mxu0 %vm90_vm1, %v438_v2  ;;  %422 = vmatprep.mubr.msk.bf16.mxu1 %vm90_vm1, %v439_v3 }
   0x7   :  { %413 = vmatpush3.bf16.msra.mxu0 %v117_v4  ;;  %433 = vmatpush3.bf16.msra.mxu1 %v117_v4 }
   0xa   :  { %415 = vmatmul.mubr.msk.bf16.vlgmr.msra.gmra.mrb[0].mxu0 %vm90_vm1, %v440_v5  ;;  %423 = vmatmul.mubr.msk.bf16.vlgmr.msra.gmra.mrb[0].mxu1 %vm90_vm1, %v441_v6 }
   0xb   :  { %418 = vmatprep.mubr.msk.bf16.mxu0 %vm90_vm1, %v442_v7  ;;  %426 = vmatprep.mubr.msk.bf16.mxu1 %vm90_vm1, %v443_v8 }
  0x12   :  { %419 = vmatmul.mubr.msk.bf16.gmra.mrb[4].mxu0 %vm90_vm1, %v444_v9  ;;  %427 = vmatmul.mubr.msk.bf16.gmra.mrb[4].mxu1 %vm90_vm1, %v445_v10 }
  0xdd   :  { %v416_v12 = vpop.f32.mrb[0].mxu0  ;;  %v424_v13 = vpop.f32.mrb[0].mxu1 }
  0xde   :  { %v162_v14 = vadd.f32 %v416_v12, %v507_v11  ;;  %v194_v15 = vadd.f32 %v424_v13, %v507_v11  ;;  %v153_v16 = vpop.f32.mrb[1].mxu0  ;;  %v185_v17 = vpop.f32.mrb[1].mxu1 }
  0xdf   :  { %v154_v18 = vadd.f32 %v507_v11, %v153_v16  ;;  %v186_v19 = vadd.f32 %v507_v11, %v185_v17  ;;  %v417_v20 = vpop.f32.mrb[2].mxu0  ;;  %v425_v21 = vpop.f32.mrb[2].mxu1 }
  0xe0   :  { %vm218_vm3 = vcmp.ge.f32.partialorder %v162_v14, 0.0  ;;  %v234_v22 = vmul.f32 0.1, %v162_v14  ;;  %vm226_vm4 = vcmp.ge.f32.partialorder %v194_v15, 0.0  ;;  %v242_v23 = vmul.f32 0.1, %v194_v15 }
  0xe1   :  { %vm216_vm5 = vcmp.ge.f32.partialorder %v154_v18, 0.0  ;;  %v232_v24 = vmul.f32 0.1, %v154_v18  ;;  %vm224_vm6 = vcmp.ge.f32.partialorder %v186_v19, 0.0  ;;  %v240_v25 = vmul.f32 0.1, %v186_v19 }
  0xe2   :  { %v250_v26 = vsel %vm218_vm3, %v162_v14, %v234_v22  ;;  %v258_v27 = vsel %vm226_vm4, %v194_v15, %v242_v23  ;;  %v165_v28 = vadd.f32 %v417_v20, %v507_v11  ;;  %v197_v29 = vadd.f32 %v425_v21, %v507_v11  ;;  %v156_v30 = vpop.f32.mrb[3].mxu0  ;;  %v188_v31 = vpop.f32.mrb[3].mxu1 }
  0xe3   :  { %v386_v32 = vpack.c.bf16 %v250_v26, %v250_v26  ;;  %v394_v33 = vpack.c.bf16 %v258_v27, %v258_v27  ;;  %v248_v34 = vsel %vm216_vm5, %v154_v18, %v232_v24  ;;  %v256_v35 = vsel %vm224_vm6, %v186_v19, %v240_v25 }
  0xe4   :  { %v384_v36 = vpack.c.bf16 %v248_v34, %v248_v34  ;;  %v392_v37 = vpack.c.bf16 %v256_v35, %v256_v35  ;;  %vm219_vm7 = vcmp.ge.f32.partialorder %v165_v28, 0.0  ;;  %v235_v38 = vmul.f32 0.1, %v165_v28 }
  0xe5   :  { %331 = vst.msk [vmem:[%s592_s3 + $0x8] sm:$0xf] %vm328_vm2, %v386_v32  ;;  %339 = vst.msk [vmem:[%s592_s3 + $0x28] sm:$0xf] %vm328_vm2, %v394_v33  ;;  %vm227_vm8 = vcmp.ge.f32.partialorder %v197_v29, 0.0  ;;  %v157_v40 = vadd.f32 %v507_v11, %v156_v30  ;;  %v189_v41 = vadd.f32 %v507_v11, %v188_v31  ;;  %v420_v42 = vpop.f32.mrb[4].mxu0 }
  0xe6   :  { %v243_v39 = vmul.f32 0.1, %v197_v29  ;;  %v428_v43 = vpop.f32.mrb[4].mxu1  ;;  %329 = vst.msk [vmem:[%s592_s3] sm:$0xf] %vm328_vm2, %v384_v36  ;;  %v251_v44 = vsel %vm219_vm7, %v165_v28, %v235_v38  ;;  %v178_v45 = vadd.f32 %v420_v42, %v507_v11  ;;  %v169_v47 = vpop.f32.mrb[5].mxu0 }
  0xe7   :  { %337 = vst.msk [vmem:[%s592_s3 + $0x20] sm:$0xf] %vm328_vm2, %v392_v37  ;;  %v210_v46 = vadd.f32 %v428_v43, %v507_v11  ;;  %v201_v48 = vpop.f32.mrb[5].mxu1  ;;  %v387_v49 = vpack.c.bf16 %v251_v44, %v251_v44  ;;  %vm217_vm9 = vcmp.ge.f32.partialorder %v157_v40, 0.0  ;;  %v233_v51 = vmul.f32 0.1, %v157_v40 }
  0xe8   :  { %v259_v50 = vsel %vm227_vm8, %v197_v29, %v243_v39  ;;  %v421_v52 = vpop.f32.mrb[6].mxu0  ;;  %v429_v53 = vpop.f32.mrb[6].mxu1  ;;  %vm225_vm10 = vcmp.ge.f32.partialorder %v189_v41, 0.0  ;;  %v241_v55 = vmul.f32 0.1, %v189_v41  ;;  %vm222_vm11 = vcmp.ge.f32.partialorder %v178_v45, 0.0 }
  0xe9   :  { %v395_v54 = vpack.c.bf16 %v259_v50, %v259_v50  ;;  %v172_v56 = vpop.f32.mrb[7].mxu0  ;;  %v204_v57 = vpop.f32.mrb[7].mxu1  ;;  %332 = vst.msk [vmem:[%s592_s3 + $0xc] sm:$0xf] %vm328_vm2, %v387_v49  ;;  %v249_v58 = vsel %vm217_vm9, %v157_v40, %v233_v51  ;;  %v238_v59 = vmul.f32 0.1, %v178_v45  ;;  %v170_v63 = vadd.f32 %v507_v11, %v169_v47 }
  0xea   :  { %vm230_vm12 = vcmp.ge.f32.partialorder %v210_v46, 0.0  ;;  %v246_v60 = vmul.f32 0.1, %v210_v46  ;;  %v385_v61 = vpack.c.bf16 %v249_v58, %v249_v58  ;;  %v257_v62 = vsel %vm225_vm10, %v189_v41, %v241_v55 }
  0xeb   :  { %340 = vst.msk [vmem:[%s592_s3 + $0x2c] sm:$0xf] %vm328_vm2, %v395_v54  ;;  %v202_v0 = vadd.f32 %v507_v11, %v201_v48  ;;  %v393_v1 = vpack.c.bf16 %v257_v62, %v257_v62  ;;  %v254_v2 = vsel %vm222_vm11, %v178_v45, %v238_v59  ;;  %v181_v4 = vadd.f32 %v421_v52, %v507_v11 }
  0xec   :  { %v262_v3 = vsel %vm230_vm12, %v210_v46, %v246_v60  ;;  %330 = vst.msk [vmem:[%s592_s3 + $0x4] sm:$0xf] %vm328_vm2, %v385_v61  ;;  %v390_v5 = vpack.c.bf16 %v254_v2, %v254_v2  ;;  %vm220_vm13 = vcmp.ge.f32.partialorder %v170_v63, 0.0  ;;  %v236_v7 = vmul.f32 0.1, %v170_v63 }
  0xed   :  { %v398_v6 = vpack.c.bf16 %v262_v3, %v262_v3  ;;  %338 = vst.msk [vmem:[%s592_s3 + $0x24] sm:$0xf] %vm328_vm2, %v393_v1  ;;  %vm228_vm14 = vcmp.ge.f32.partialorder %v202_v0, 0.0  ;;  %v244_v8 = vmul.f32 0.1, %v202_v0  ;;  %vm223_vm15 = vcmp.ge.f32.partialorder %v181_v4, 0.0 }
  0xee   :  { %v239_v9 = vmul.f32 0.1, %v181_v4  ;;  %335 = vst.msk [vmem:[%s592_s3 + $0x18] sm:$0xf] %vm328_vm2, %v390_v5  ;;  %v252_v10 = vsel %vm220_vm13, %v170_v63, %v236_v7  ;;  %v213_v12 = vadd.f32 %v429_v53, %v507_v11  ;;  %v173_v13 = vadd.f32 %v507_v11, %v172_v56 }
  0xef   :  { %343 = vst.msk [vmem:[%s592_s3 + $0x38] sm:$0xf] %vm328_vm2, %v398_v6  ;;  %v205_v14 = vadd.f32 %v507_v11, %v204_v57  ;;  %v388_v15 = vpack.c.bf16 %v252_v10, %v252_v10  ;;  %v260_v16 = vsel %vm228_vm14, %v202_v0, %v244_v8 }
  0xf0   :  { %v255_v17 = vsel %vm223_vm15, %v181_v4, %v239_v9  ;;  %v396_v18 = vpack.c.bf16 %v260_v16, %v260_v16  ;;  %vm231_vm0 = vcmp.ge.f32.partialorder %v213_v12, 0.0  ;;  %v247_v20 = vmul.f32 0.1, %v213_v12 }
  0xf1   :  { %v391_v19 = vpack.c.bf16 %v255_v17, %v255_v17  ;;  %333 = vst.msk [vmem:[%s592_s3 + $0x10] sm:$0xf] %vm328_vm2, %v388_v15  ;;  %vm221_vm1 = vcmp.ge.f32.partialorder %v173_v13, 0.0  ;;  %v237_v21 = vmul.f32 0.1, %v173_v13  ;;  %vm229_vm3 = vcmp.ge.f32.partialorder %v205_v14, 0.0 }
  0xf2   :  { %v245_v22 = vmul.f32 0.1, %v205_v14  ;;  %341 = vst.msk [vmem:[%s592_s3 + $0x30] sm:$0xf] %vm328_vm2, %v396_v18  ;;  %v263_v11 = vsel %vm231_vm0, %v213_v12, %v247_v20 }
  0xf3   :  { %336 = vst.msk [vmem:[%s592_s3 + $0x1c] sm:$0xf] %vm328_vm2, %v391_v19  ;;  %v399_v23 = vpack.c.bf16 %v263_v11, %v263_v11  ;;  %v253_v24 = vsel %vm221_vm1, %v173_v13, %v237_v21 }
  0xf4   :  { %v261_v25 = vsel %vm229_vm3, %v205_v14, %v245_v22  ;;  %v389_v26 = vpack.c.bf16 %v253_v24, %v253_v24 }
  0xf5   :  { %v397_v27 = vpack.c.bf16 %v261_v25, %v261_v25  ;;  %344 = vst.msk [vmem:[%s592_s3 + $0x3c] sm:$0xf] %vm328_vm2, %v399_v23 }
  0xf6   :  { %334 = vst.msk [vmem:[%s592_s3 + $0x14] sm:$0xf] %vm328_vm2, %v389_v26 }
  0xf7   :  { %342 = vst.msk [vmem:[%s592_s3 + $0x34] sm:$0xf] %vm328_vm2, %v397_v27 }

// kernel: _lambda_.8
= control target key start
LH: loop header
LB: loop body
LE: loop exit
PB: predicated region body
PF: predicated region fallthrough
CT: control target
= control target key end

     0   :  { %v267_v0 = vmov 0   ;;  %vm116_vm0 = vcmask 130048   ;;  %vm200_vm3 = vcmask 257024   ;;  %s342_s1 = inlined_call_operand.vmem [shape: bf16[1,144,32], index: 1, kind: input, shape index: {}]   ;;  %s343_s0 = inlined_call_operand.vmem [shape: bf16[1,32,144], index: 0, kind: input, shape index: {}]   ;;  %s344_s2 = inlined_call_operand.vmem [shape: f32[1,32], index: 2, kind: input, shape index: {}]   ;;  %s345_s3 = inlined_call_operand.vmem [shape: bf16[1,32,32], index: 3, kind: output, shape index: {}]  }
   0x1   :  { %123 = vmatprep.subr.bf16.mxu0 %v267_v0  ;;  %233 = vmatprep.subr.bf16.mxu1 %v267_v0  ;;  %v252_v1 = vld [vmem:[%s342_s1] sm:$0xff]   ;;  %v253_v2 = vld [vmem:[%s342_s1 + $0x8] sm:$0xff]   ;;  %v254_v3 = vld [vmem:[%s342_s1 + $0x10] sm:$0xff]  }
   0x2   :  { %124 = vmatpush1.bf16.msra.mxu0 %v252_v1  ;;  %242 = vmatpush1.bf16.msra.mxu1 %v252_v1  ;;  %v255_v4 = vld [vmem:[%s342_s1 + $0x18] sm:$0xff]   ;;  %v263_v5 = vld [vmem:[%s343_s0 + $0x4] ss:$8 sps:$4 sm:$0xff]   ;;  %v258_v9 = vld [vmem:[%s342_s1 + $0x30] sm:$0xff]  }
   0x3   :  { %125 = vmatprep.subr.bf16.mxu0 %v267_v0  ;;  %234 = vmatprep.subr.bf16.mxu1 %v267_v0  ;;  %v266_v6 = vld [vmem:[%s343_s0 + $0x14] ss:$8 sps:$4 sm:$0xff]   ;;  %v256_v7 = vld [vmem:[%s342_s1 + $0x20] sm:$0xff]   ;;  %v257_v8 = vld [vmem:[%s342_s1 + $0x28] sm:$0xff]  }
   0x4   :  { %223 = vmatprep.mubr.msk.bf16.mxu0 %vm116_vm0, %v263_v5  ;;  %224 = vmatprep.mubr.msk.bf16.mxu1 %vm116_vm0, %v266_v6  ;;  %v259_v10 = vld [vmem:[%s342_s1 + $0x38] sm:$0xff]   ;;  %v260_v11 = vld [vmem:[%s342_s1 + $0x40] sm:$0xff]  }
   0x5   :  { %v261_v12 = vld [vmem:[%s343_s0] ss:$8 sps:$4 sm:$0xff]   ;;  %v264_v13 = vld [vmem:[%s343_s0 + $0x10] ss:$8 sps:$4 sm:$0xff]  }
   0x6   :  { %126 = vmatpush1.bf16.msra.mxu0 %v253_v2  ;;  %243 = vmatpush1.bf16.msra.mxu1 %v253_v2  ;;  %v209_v14 = vld [vmem:[%s344_s2] ss:$0 sm:$0xff] }
   0x7   :  { %127 = vmatprep.subr.bf16.mxu0 %v267_v0  ;;  %235 = vmatprep.subr.bf16.mxu1 %v267_v0 }
   0xa   :  { %128 = vmatpush1.bf16.msra.mxu0 %v254_v3  ;;  %244 = vmatpush1.bf16.msra.mxu1 %v254_v3 }
   0xb   :  { %129 = vmatprep.subr.bf16.mxu0 %v267_v0  ;;  %236 = vmatprep.subr.bf16.mxu1 %v267_v0 }
   0xe   :  { %130 = vmatpush1.bf16.msra.mxu0 %v255_v4  ;;  %245 = vmatpush1.bf16.msra.mxu1 %v255_v4 }
   0xf   :  { %131 = vmatprep.subr.bf16.mxu0 %v267_v0  ;;  %237 = vmatprep.subr.bf16.mxu1 %v267_v0 }
  0x12   :  { %132 = vmatpush1.bf16.msra.mxu0 %v256_v7  ;;  %246 = vmatpush1.bf16.msra.mxu1 %v256_v7 }
  0x13   :  { %133 = vmatprep.subr.bf16.mxu0 %v267_v0  ;;  %238 = vmatprep.subr.bf16.mxu1 %v267_v0 }
  0x16   :  { %134 = vmatpush1.bf16.msra.mxu0 %v257_v8  ;;  %247 = vmatpush1.bf16.msra.mxu1 %v257_v8 }
  0x17   :  { %135 = vmatprep.subr.bf16.mxu0 %v267_v0  ;;  %239 = vmatprep.subr.bf16.mxu1 %v267_v0 }
  0x1a   :  { %136 = vmatpush1.bf16.msra.mxu0 %v258_v9  ;;  %248 = vmatpush1.bf16.msra.mxu1 %v258_v9 }
  0x1b   :  { %137 = vmatprep.subr.bf16.mxu0 %v267_v0  ;;  %240 = vmatprep.subr.bf16.mxu1 %v267_v0 }
  0x1e   :  { %138 = vmatpush1.bf16.msra.mxu0 %v259_v10  ;;  %249 = vmatpush1.bf16.msra.mxu1 %v259_v10 }
  0x1f   :  { %139 = vmatprep.subr.bf16.mxu0 %v267_v0  ;;  %241 = vmatprep.subr.bf16.mxu1 %v267_v0 }
  0x22   :  { %140 = vmatpush1.bf16.msra.mxu0 %v260_v11  ;;  %250 = vmatpush1.bf16.msra.mxu1 %v260_v11 }
  0x25   :  { %156 = vmatmul.mubr.bf16.vlgmr.msra.gmra.mrb[0].mxu0 %v261_v12  ;;  %164 = vmatmul.mubr.bf16.vlgmr.msra.gmra.mrb[0].mxu1 %v264_v13 }
  0xf8   :  { %v157_v15 = vpop.f32.mrb[0].mxu0  ;;  %v165_v16 = vpop.f32.mrb[0].mxu1 }
  0xf9   :  { %v158_v17 = vadd.f32 %v209_v14, %v157_v15  ;;  %v166_v18 = vadd.f32 %v209_v14, %v165_v16  ;;  %v159_v19 = vpop.f32.mrb[1].mxu0  ;;  %v167_v20 = vpop.f32.mrb[1].mxu1 }
  0xfa   :  { %v160_v21 = vpop.f32.mrb[2].mxu0  ;;  %v168_v22 = vpop.f32.mrb[2].mxu1 }
  0xfb   :  { %vm172_vm1 = vcmp.ge.f32.partialorder %v158_v17, 0.0  ;;  %v176_v23 = vmul.f32 0.1, %v158_v17  ;;  %vm174_vm2 = vcmp.ge.f32.partialorder %v166_v18, 0.0  ;;  %v178_v24 = vmul.f32 0.1, %v166_v18 }
  0xfc   :  { %v161_v25 = vadd.f32 %v209_v14, %v160_v21  ;;  %v169_v26 = vadd.f32 %v209_v14, %v168_v22  ;;  %v162_v27 = vpop.f32.mrb[3].mxu0  ;;  %v170_v28 = vpop.f32.mrb[3].mxu1 }
  0xfd   :  { %v180_v29 = vsel %vm172_vm1, %v158_v17, %v176_v23  ;;  %v182_v30 = vsel %vm174_vm2, %v166_v18, %v178_v24 }
  0xfe   :  { %v229_v31 = vpack.c.bf16 %v180_v29, %v180_v29  ;;  %v231_v32 = vpack.c.bf16 %v182_v30, %v182_v30  ;;  %vm173_vm4 = vcmp.ge.f32.partialorder %v161_v25, 0.0  ;;  %v177_v33 = vmul.f32 0.1, %v161_v25 }
  0xff   :  { %vm175_vm5 = vcmp.ge.f32.partialorder %v169_v26, 0.0  ;;  %v179_v34 = vmul.f32 0.1, %v169_v26 }
 0x100   :  { %201 = vst.msk [vmem:[%s345_s3] sm:$0xf] %vm200_vm3, %v229_v31  ;;  %203 = vst.msk [vmem:[%s345_s3 + $0x8] sm:$0xf] %vm200_vm3, %v231_v32  ;;  %v181_v35 = vsel %vm173_vm4, %v161_v25, %v177_v33 }
 0x101   :  { %v230_v36 = vpack.c.bf16 %v181_v35, %v181_v35  ;;  %v183_v37 = vsel %vm175_vm5, %v169_v26, %v179_v34 }
 0x102   :  { %v232_v38 = vpack.c.bf16 %v183_v37, %v183_v37 }
 0x103   :  { %202 = vst.msk [vmem:[%s345_s3 + $0x4] sm:$0xf] %vm200_vm3, %v230_v36 }
 0x104   :  { %204 = vst.msk [vmem:[%s345_s3 + $0xc] sm:$0xf] %vm200_vm3, %v232_v38 }

// kernel: _lambda_.9
= control target key start
LH: loop header
LB: loop body
LE: loop exit
PB: predicated region body
PF: predicated region fallthrough
CT: control target
= control target key end

     0   :  { %v376_v1 = vmov 0.0   ;;  %vm377_vm0 = vmmov 0   ;;  %vm185_vm1 = vcmask 261120   ;;  %vm285_vm3 = vcmask 519168   ;;  %s470_s1 = inlined_call_operand.vmem [shape: bf16[1,288,64], index: 1, kind: input, shape index: {}]   ;;  %s471_s0 = inlined_call_operand.vmem [shape: bf16[1,16,288], index: 0, kind: input, shape index: {}]   ;;  %s472_s2 = inlined_call_operand.vmem [shape: f32[1,64], index: 2, kind: input, shape index: {}]   ;;  %s473_s3 = inlined_call_operand.vmem [shape: bf16[1,16,64], index: 3, kind: output, shape index: {}]  }
   0x1   :  { %v354_v0 = vld [vmem:[%s470_s1 + $0x40] sm:$0xff]   ;;  %344 = vmatprep.subr.bf16.mxu1 %v376_v1  ;;  %348 = vmatprep.mubr.msk.bf16.mxu1 %vm377_vm0, %v376_v1  ;;  %v356_v3 = vld [vmem:[%s470_s1 + $0x48] sm:$0xff]   ;;  %v358_v5 = vld [vmem:[%s470_s1 + $0x50] sm:$0xff]  }
   0x2   :  { %v355_v2 = vld [vmem:[%s470_s1] sm:$0xff]   ;;  %319 = vmatprep.subr.bf16.mxu0 %v354_v0  ;;  %v357_v4 = vld [vmem:[%s470_s1 + $0x8] sm:$0xff]   ;;  %v359_v6 = vld [vmem:[%s470_s1 + $0x10] sm:$0xff]  }
   0x3   :  { %320 = vmatpush3.bf16.msra.mxu0 %v355_v2  ;;  %v360_v7 = vld [vmem:[%s470_s1 + $0x58] sm:$0xff]   ;;  %v362_v9 = vld [vmem:[%s470_s1 + $0x60] sm:$0xff]   ;;  %v364_v12 = vld [vmem:[%s470_s1 + $0x68] sm:$0xff]  }
   0x4   :  { %321 = vmatprep.subr.bf16.mxu0 %v356_v3  ;;  %v361_v8 = vld [vmem:[%s470_s1 + $0x18] sm:$0xff]   ;;  %v368_v10 = vld [vmem:[%s470_s1 + $0x80] sm:$0xff]   ;;  %v365_v13 = vld [vmem:[%s470_s1 + $0x28] sm:$0xff]  }
   0x5   :  { %v363_v11 = vld [vmem:[%s470_s1 + $0x20] sm:$0xff]   ;;  %345 = vmatpush3.bf16.msra.mxu1 %v368_v10  ;;  %v374_v15 = vld [vmem:[%s470_s1 + $0x88] sm:$0xff]   ;;  %v366_v16 = vld [vmem:[%s470_s1 + $0x70] sm:$0xff]  }
   0x6   :  { %346 = vmatprep.subr.bf16.mxu1 %v376_v1  ;;  %v373_v14 = vld [vmem:[%s471_s0 + $0x4] ss:$12 sps:$4 sm:$0xff]   ;;  %v375_v17 = vld [vmem:[%s471_s0 + $0x8] ss:$12 sps:$4 sm:$0xff]   ;;  %v369_v19 = vld [vmem:[%s470_s1 + $0x78] sm:$0xff]  }
   0x7   :  { %322 = vmatpush3.bf16.msra.mxu0 %v357_v4  ;;  %221 = vmatprep.mubr.bf16.mxu0 %v373_v14  ;;  %v367_v18 = vld [vmem:[%s470_s1 + $0x30] sm:$0xff]   ;;  %v370_v20 = vld [vmem:[%s470_s1 + $0x38] sm:$0xff]   ;;  %v371_v21 = vld [vmem:[%s471_s0] ss:$12 sps:$4 sm:$0xff]  }
   0x8   :  { %323 = vmatprep.subr.bf16.mxu0 %v358_v5  ;;  %v292_v28 = vld [vmem:[%s472_s2] ss:$0 sm:$0xff] }
   0x9   :  { %347 = vmatpush3.bf16.msra.mxu1 %v374_v15 }
   0xb   :  { %324 = vmatpush3.bf16.msra.mxu0 %v359_v6 }
   0xc   :  { %325 = vmatprep.subr.bf16.mxu0 %v360_v7  ;;  %349 = vmatmul.mubr.msk.bf16.vlgmr.msra.gmra.mrb[0].mxu1 %vm185_vm1, %v375_v17 }
   0xf   :  { %326 = vmatpush3.bf16.msra.mxu0 %v361_v8 }
  0x10   :  { %327 = vmatprep.subr.bf16.mxu0 %v362_v9 }
  0x13   :  { %328 = vmatpush3.bf16.msra.mxu0 %v363_v11 }
  0x14   :  { %329 = vmatprep.subr.bf16.mxu0 %v364_v12 }
  0x17   :  { %330 = vmatpush3.bf16.msra.mxu0 %v365_v13 }
  0x18   :  { %331 = vmatprep.subr.bf16.mxu0 %v366_v16 }
  0x1b   :  { %332 = vmatpush3.bf16.msra.mxu0 %v367_v18 }
  0x1c   :  { %333 = vmatprep.subr.bf16.mxu0 %v369_v19 }
  0x1f   :  { %334 = vmatpush3.bf16.msra.mxu0 %v370_v20 }
  0x22   :  { %222 = vmatmul.mubr.bf16.vlgmr.msra.gmra.mrb[0].mxu0 %v371_v21 }
  0xdf   :  { %v264_v22 = vpop.f32.mrb[0].mxu1 }
  0xe0   :  { %v350_v23 = vpop.f32.mrb[1].mxu1 }
  0xe1   :  { %v267_v24 = vpop.f32.mrb[2].mxu1 }
  0xe2   :  { %v351_v25 = vpop.f32.mrb[3].mxu1 }
  0xf5   :  { %v335_v26 = vpop.f32.mrb[0].mxu0 }
  0xf6   :  { %v336_v27 = vpop.f32.mrb[1].mxu0 }
  0xf7   :  { %v337_v29 = vadd.f32 %v336_v27, %v335_v26  ;;  %v338_v30 = vpop.f32.mrb[2].mxu0 }
  0xf8   :  { %v339_v31 = vpop.f32.mrb[3].mxu0 }
  0xf9   :  { %v224_v32 = vadd.f32 %v337_v29, %v292_v28  ;;  %v340_v33 = vadd.f32 %v339_v31, %v338_v30 }
  0xfb   :  { %v265_v34 = vadd.f32 %v264_v22, %v224_v32  ;;  %v227_v35 = vadd.f32 %v340_v33, %v292_v28 }
  0xfd   :  { %vm271_vm2 = vcmp.ge.f32.partialorder %v265_v34, 0.0  ;;  %v273_v36 = vmul.f32 0.1, %v265_v34  ;;  %v268_v37 = vadd.f32 %v267_v24, %v227_v35 }
  0xff   :  { %v275_v38 = vsel %vm271_vm2, %v265_v34, %v273_v36  ;;  %vm272_vm4 = vcmp.ge.f32.partialorder %v268_v37, 0.0  ;;  %v274_v39 = vmul.f32 0.1, %v268_v37 }
 0x100   :  { %v317_v40 = vpack.c.bf16 %v275_v38, %v275_v38 }
 0x101   :  { %v276_v41 = vsel %vm272_vm4, %v268_v37, %v274_v39 }
 0x102   :  { %286 = vst.msk [vmem:[%s473_s3] sm:$0xf] %vm285_vm3, %v317_v40  ;;  %v318_v42 = vpack.c.bf16 %v276_v41, %v276_v41 }
 0x104   :  { %287 = vst.msk [vmem:[%s473_s3 + $0x4] sm:$0xf] %vm285_vm3, %v318_v42 }

// kernel: _lambda_.10
= control target key start
LH: loop header
LB: loop body
LE: loop exit
PB: predicated region body
PF: predicated region fallthrough
CT: control target
= control target key end

     0   :  { %s689_s12 = smov 0   ;;  %s691_s13 = smov 0   ;;  %s751_s0 = inlined_call_operand.vmem [shape: bf16[4,16,256], index: 0, kind: input, shape index: {}]   ;;  %s752_s1 = inlined_call_operand.vmem [shape: bf16[4,256,32], index: 1, kind: input, shape index: {}]   ;;  %s753_s2 = inlined_call_operand.vmem [shape: f32[1,32], index: 2, kind: input, shape index: {}]   ;;  %s754_s3 = inlined_call_operand.vmem [shape: bf16[4,16,32], index: 3, kind: output, shape index: {}]  }
   0x1   :  { %s693_s14 = smov 0  }
   0x2 LB: > { %s25_s15 = sadd.s32 1, %s663_s13  ;;  %p545_p0 = scmp.ge.s32.totalorder %s667_s14, 1  ;;  %s667_s14 = sphi %s693_s14, %s13_s14   ;;  %s663_s13 = sphi %s691_s13, %s756_s13   ;;  %s659_s12 = sphi %s689_s12, %s755_s12  }
   0x3   : > { %p27_p1 = scmp.ge.s32.totalorder %s25_s15, 4  ;;  %p169_p2 = scmp.lt.s32.totalorder %s667_s14, 5 }
   0x5   : > { %s758_s15 = smov (%p27_p1, %s25_s15), 0  ;;  %p170_p3 = pnand %p545_p0, %p169_p2 }
   0x6   : > { %p208_p4 = scmp.lt.s32.totalorder (!%p170_p3), %s659_s12, 3  ;;  %v552_v19 = vld [vmem:[%s753_s2] ss:$0 sm:$0xff] (!%p170_p3)  ;;  %vm436_vm1 = vcmask (!%p170_p3), 257024  }
   0x7   : > { %173 = sbr.rel (%p170_p3) target bundleno = 275 (0x113), region = 32 }
   0xe   : > { %s760_s12 = smov (!%p208_p4, %s659_s12), 3 }
   0xf   : > { %s576_s16 = sshll.u32 %s760_s12, 7  ;;  %s575_s20 = sshll.u32 %s760_s12, 4 }
  0x10   : > { %s713_s19 = scalar_lea.vmem %s752_s1, %s576_s16  ;;  %s216_s23 = scalar_lea.vmem %s751_s0, %s575_s20 }
  0x11   : > { %v626_v0 = vld [vmem:[%s713_s19 + $0x40] sm:$0xff]   ;;  %v628_v2 = vld [vmem:[%s713_s19 + $0x48] sm:$0xff]   ;;  %v630_v4 = vld [vmem:[%s713_s19 + $0x50] sm:$0xff]   ;;  %s577_s26 = sshll.u32 %s760_s12, 3 }
  0x12   : > { %v627_v1 = vld [vmem:[%s713_s19] sm:$0xff]   ;;  %580 = vmatprep.subr.bf16.mxu0 %v626_v0  ;;  %v629_v3 = vld [vmem:[%s713_s19 + $0x8] sm:$0xff]   ;;  %v631_v5 = vld [vmem:[%s713_s19 + $0x10] sm:$0xff]   ;;  %s231_s29 = scalar_lea.vmem %s754_s3, %s577_s26 }
  0x13   : > { %581 = vmatpush3.bf16.msra.mxu0 %v627_v1  ;;  %v632_v6 = vld [vmem:[%s713_s19 + $0x58] sm:$0xff]   ;;  %v634_v8 = vld [vmem:[%s713_s19 + $0x60] sm:$0xff]   ;;  %v636_v10 = vld [vmem:[%s713_s19 + $0x68] sm:$0xff]  }
  0x14   : > { %582 = vmatprep.subr.bf16.mxu0 %v628_v2  ;;  %v633_v7 = vld [vmem:[%s713_s19 + $0x18] sm:$0xff]   ;;  %v635_v9 = vld [vmem:[%s713_s19 + $0x20] sm:$0xff]   ;;  %v637_v12 = vld [vmem:[%s713_s19 + $0x28] sm:$0xff]  }
  0x15   : > { %v644_v11 = vld [vmem:[%s216_s23 + $0x4] ss:$8 sps:$4 sm:$0xff]   ;;  %v638_v13 = vld [vmem:[%s713_s19 + $0x70] sm:$0xff]   ;;  %v640_v15 = vld [vmem:[%s713_s19 + $0x78] sm:$0xff]  }
  0x16   : > { %413 = vmatprep.mubr.bf16.mxu0 %v644_v11  ;;  %v639_v14 = vld [vmem:[%s713_s19 + $0x30] sm:$0xff]   ;;  %v641_v16 = vld [vmem:[%s713_s19 + $0x38] sm:$0xff]   ;;  %v642_v17 = vld [vmem:[%s216_s23] ss:$8 sps:$4 sm:$0xff]  }
  0x17   : > { %583 = vmatpush3.bf16.msra.mxu0 %v629_v3 }
  0x18   : > { %584 = vmatprep.subr.bf16.mxu0 %v630_v4 }
  0x1b   : > { %585 = vmatpush3.bf16.msra.mxu0 %v631_v5 }
  0x1c   : > { %586 = vmatprep.subr.bf16.mxu0 %v632_v6 }
  0x1f   : > { %587 = vmatpush3.bf16.msra.mxu0 %v633_v7 }
  0x20   : > { %588 = vmatprep.subr.bf16.mxu0 %v634_v8 }
  0x23   : > { %589 = vmatpush3.bf16.msra.mxu0 %v635_v9 }
  0x24   : > { %590 = vmatprep.subr.bf16.mxu0 %v636_v10 }
  0x27   : > { %591 = vmatpush3.bf16.msra.mxu0 %v637_v12 }
  0x28   : > { %592 = vmatprep.subr.bf16.mxu0 %v638_v13 }
  0x2b   : > { %593 = vmatpush3.bf16.msra.mxu0 %v639_v14 }
  0x2c   : > { %594 = vmatprep.subr.bf16.mxu0 %v640_v15 }
  0x2f   : > { %595 = vmatpush3.bf16.msra.mxu0 %v641_v16 }
  0x32   : > { %414 = vmatmul.mubr.bf16.vlgmr.msra.gmra.mrb[0].mxu0 %v642_v17 }
 0x105   : > { %v596_v18 = vpop.f32.mrb[0].mxu0 }
 0x106   : > { %v597_v20 = vpop.f32.mrb[1].mxu0 }
 0x107   : > { %v598_v21 = vadd.f32 %v597_v20, %v596_v18  ;;  %v599_v22 = vpop.f32.mrb[2].mxu0 }
 0x108   : > { %v600_v23 = vpop.f32.mrb[3].mxu0 }
 0x109   : > { %v416_v24 = vadd.f32 %v598_v21, %v552_v19  ;;  %v601_v25 = vadd.f32 %v600_v23, %v599_v22 }
 0x10b   : > { %vm422_vm0 = vcmp.ge.f32.partialorder %v416_v24, 0.0  ;;  %v424_v26 = vmul.f32 0.1, %v416_v24  ;;  %v419_v27 = vadd.f32 %v601_v25, %v552_v19 }
 0x10d   : > { %v426_v28 = vsel %vm422_vm0, %v416_v24, %v424_v26  ;;  %vm423_vm2 = vcmp.ge.f32.partialorder %v419_v27, 0.0  ;;  %v425_v29 = vmul.f32 0.1, %v419_v27 }
 0x10e   : > { %v578_v30 = vpack.c.bf16 %v426_v28, %v426_v28 }
 0x10f   : > { %v427_v31 = vsel %vm423_vm2, %v419_v27, %v425_v29 }
 0x110   : > { %437 = vst.msk [vmem:[%s231_s29] sm:$0xf] %vm436_vm1, %v578_v30  ;;  %v579_v32 = vpack.c.bf16 %v427_v31, %v427_v31 }
 0x112   : > { %438 = vst.msk [vmem:[%s231_s29 + $0x4] sm:$0xf] %vm436_vm1, %v579_v32 }
 0x113 PF: > { %s13_s14 = sadd.s32 1, %s667_s14   ;;  %s755_s12 = smov %s663_s13 }
 0x114   : > { %p10_p5 = scmp.ge.s32.totalorder %s13_s14, 6   ;;  %s756_s13 = smov %s758_s15 }
 0x116   :  { %12 = sbr.rel (!%p10_p5) target bundleno = 2 (0x2), region = 65 }

// kernel: _lambda_.11
= control target key start
LH: loop header
LB: loop body
LE: loop exit
PB: predicated region body
PF: predicated region fallthrough
CT: control target
= control target key end

     0   :  { %s756_s12 = smov 0   ;;  %s758_s13 = smov 0   ;;  %s818_s0 = inlined_call_operand.vmem [shape: bf16[4,32,256], index: 0, kind: input, shape index: {}]   ;;  %s819_s1 = inlined_call_operand.vmem [shape: bf16[4,256,16], index: 1, kind: input, shape index: {}]   ;;  %s820_s2 = inlined_call_operand.vmem [shape: f32[1,16], index: 2, kind: input, shape index: {}]   ;;  %s821_s3 = inlined_call_operand.vmem [shape: bf16[4,32,16], index: 3, kind: output, shape index: {}]  }
   0x1   :  { %s760_s14 = smov 0  }
   0x2 LB: > { %s25_s15 = sadd.s32 1, %s730_s13  ;;  %p581_p0 = scmp.ge.s32.totalorder %s734_s14, 1  ;;  %s734_s14 = sphi %s760_s14, %s13_s14   ;;  %s730_s13 = sphi %s758_s13, %s823_s13   ;;  %s726_s12 = sphi %s756_s12, %s822_s12  }
   0x3   : > { %p27_p1 = scmp.ge.s32.totalorder %s25_s15, 4  ;;  %p169_p2 = scmp.lt.s32.totalorder %s734_s14, 5 }
   0x5   : > { %s825_s15 = smov (%p27_p1, %s25_s15), 0  ;;  %p170_p3 = pnand %p581_p0, %p169_p2 }
   0x6   : > { %p208_p4 = scmp.lt.s32.totalorder (!%p170_p3), %s726_s12, 3  ;;  %v588_v22 = vld [vmem:[%s820_s2] ss:$0 sm:$0xff] (!%p170_p3)  ;;  %vm470_vm2 = vcmask (!%p170_p3), 125952  }
   0x7   : > { %173 = sbr.rel (%p170_p3) target bundleno = 277 (0x115), region = 32 }
   0xe   : > { %s827_s12 = smov (!%p208_p4, %s726_s12), 3 }
   0xf   : > { %s616_s16 = sshll.u32 %s827_s12, 7  ;;  %s615_s20 = sshll.u32 %s827_s12, 5 }
  0x10   : > { %s780_s19 = scalar_lea.vmem %s819_s1, %s616_s16  ;;  %s216_s23 = scalar_lea.vmem %s818_s0, %s615_s20 }
  0x11   : > { %v690_v0 = vld [vmem:[%s780_s19 + $0x40] sm:$0xff]   ;;  %v692_v2 = vld [vmem:[%s780_s19 + $0x48] sm:$0xff]   ;;  %v694_v4 = vld [vmem:[%s780_s19 + $0x50] sm:$0xff]   ;;  %s617_s26 = sshll.u32 %s827_s12, 4 }
  0x12   : > { %v691_v1 = vld [vmem:[%s780_s19] sm:$0xff]   ;;  %622 = vmatprep.subr.bf16.mxu0 %v690_v0  ;;  %650 = vmatprep.subr.bf16.mxu1 %v690_v0  ;;  %v693_v3 = vld [vmem:[%s780_s19 + $0x8] sm:$0xff]   ;;  %v695_v5 = vld [vmem:[%s780_s19 + $0x10] sm:$0xff]   ;;  %s231_s29 = scalar_lea.vmem %s821_s3, %s617_s26 }
  0x13   : > { %623 = vmatpush3.bf16.msra.mxu0 %v691_v1  ;;  %658 = vmatpush3.bf16.msra.mxu1 %v691_v1  ;;  %v696_v6 = vld [vmem:[%s780_s19 + $0x58] sm:$0xff]   ;;  %v698_v8 = vld [vmem:[%s780_s19 + $0x60] sm:$0xff]   ;;  %v700_v10 = vld [vmem:[%s780_s19 + $0x68] sm:$0xff]  }
  0x14   : > { %624 = vmatprep.subr.bf16.mxu0 %v692_v2  ;;  %651 = vmatprep.subr.bf16.mxu1 %v692_v2  ;;  %v697_v7 = vld [vmem:[%s780_s19 + $0x18] sm:$0xff]   ;;  %v699_v9 = vld [vmem:[%s780_s19 + $0x20] sm:$0xff]   ;;  %v701_v13 = vld [vmem:[%s780_s19 + $0x28] sm:$0xff]  }
  0x15   : > { %v708_v11 = vld [vmem:[%s216_s23 + $0x4] ss:$8 sps:$4 sm:$0xff]   ;;  %v711_v12 = vld [vmem:[%s216_s23 + $0x14] ss:$8 sps:$4 sm:$0xff]   ;;  %v706_v18 = vld [vmem:[%s216_s23] ss:$8 sps:$4 sm:$0xff]  }
  0x16   : > { %v702_v14 = vld [vmem:[%s780_s19 + $0x70] sm:$0xff]   ;;  %425 = vmatprep.mubr.bf16.mxu0 %v708_v11  ;;  %433 = vmatprep.mubr.bf16.mxu1 %v711_v12  ;;  %v704_v16 = vld [vmem:[%s780_s19 + $0x78] sm:$0xff]  }
  0x17   : > { %625 = vmatpush3.bf16.msra.mxu0 %v693_v3  ;;  %659 = vmatpush3.bf16.msra.mxu1 %v693_v3  ;;  %v703_v15 = vld [vmem:[%s780_s19 + $0x30] sm:$0xff]   ;;  %v705_v17 = vld [vmem:[%s780_s19 + $0x38] sm:$0xff]  }
  0x18   : > { %626 = vmatprep.subr.bf16.mxu0 %v694_v4  ;;  %652 = vmatprep.subr.bf16.mxu1 %v694_v4  ;;  %v709_v19 = vld [vmem:[%s216_s23 + $0x10] ss:$8 sps:$4 sm:$0xff]  }
  0x1b   : > { %627 = vmatpush3.bf16.msra.mxu0 %v695_v5  ;;  %660 = vmatpush3.bf16.msra.mxu1 %v695_v5 }
  0x1c   : > { %628 = vmatprep.subr.bf16.mxu0 %v696_v6  ;;  %653 = vmatprep.subr.bf16.mxu1 %v696_v6 }
  0x1f   : > { %629 = vmatpush3.bf16.msra.mxu0 %v697_v7  ;;  %661 = vmatpush3.bf16.msra.mxu1 %v697_v7 }
  0x20   : > { %630 = vmatprep.subr.bf16.mxu0 %v698_v8  ;;  %654 = vmatprep.subr.bf16.mxu1 %v698_v8 }
  0x23   : > { %631 = vmatpush3.bf16.msra.mxu0 %v699_v9  ;;  %662 = vmatpush3.bf16.msra.mxu1 %v699_v9 }
  0x24   : > { %632 = vmatprep.subr.bf16.mxu0 %v700_v10  ;;  %655 = vmatprep.subr.bf16.mxu1 %v700_v10 }
  0x27   : > { %633 = vmatpush3.bf16.msra.mxu0 %v701_v13  ;;  %663 = vmatpush3.bf16.msra.mxu1 %v701_v13 }
  0x28   : > { %634 = vmatprep.subr.bf16.mxu0 %v702_v14  ;;  %656 = vmatprep.subr.bf16.mxu1 %v702_v14 }
  0x2b   : > { %635 = vmatpush3.bf16.msra.mxu0 %v703_v15  ;;  %664 = vmatpush3.bf16.msra.mxu1 %v703_v15 }
  0x2c   : > { %636 = vmatprep.subr.bf16.mxu0 %v704_v16  ;;  %657 = vmatprep.subr.bf16.mxu1 %v704_v16 }
  0x2f   : > { %637 = vmatpush3.bf16.msra.mxu0 %v705_v17  ;;  %665 = vmatpush3.bf16.msra.mxu1 %v705_v17 }
  0x32   : > { %426 = vmatmul.mubr.bf16.vlgmr.msra.gmra.mrb[0].mxu0 %v706_v18  ;;  %434 = vmatmul.mubr.bf16.vlgmr.msra.gmra.mrb[0].mxu1 %v709_v19 }
 0x105   : > { %v638_v20 = vpop.f32.mrb[0].mxu0  ;;  %v644_v21 = vpop.f32.mrb[0].mxu1 }
 0x106   : > { %v639_v23 = vpop.f32.mrb[1].mxu0  ;;  %v645_v24 = vpop.f32.mrb[1].mxu1 }
 0x107   : > { %v640_v25 = vadd.f32 %v639_v23, %v638_v20  ;;  %v646_v26 = vadd.f32 %v645_v24, %v644_v21  ;;  %v641_v27 = vpop.f32.mrb[2].mxu0  ;;  %v647_v28 = vpop.f32.mrb[2].mxu1 }
 0x108   : > { %v642_v29 = vpop.f32.mrb[3].mxu0  ;;  %v648_v30 = vpop.f32.mrb[3].mxu1 }
 0x109   : > { %v428_v31 = vadd.f32 %v640_v25, %v588_v22  ;;  %v436_v32 = vadd.f32 %v646_v26, %v588_v22  ;;  %v643_v33 = vadd.f32 %v642_v29, %v641_v27  ;;  %v649_v34 = vadd.f32 %v648_v30, %v647_v28 }
 0x10b   : > { %vm442_vm0 = vcmp.ge.f32.partialorder %v428_v31, 0.0  ;;  %v446_v35 = vmul.f32 0.1, %v428_v31  ;;  %vm444_vm1 = vcmp.ge.f32.partialorder %v436_v32, 0.0  ;;  %v448_v36 = vmul.f32 0.1, %v436_v32 }
 0x10c   : > { %v431_v37 = vadd.f32 %v643_v33, %v588_v22  ;;  %v439_v38 = vadd.f32 %v649_v34, %v588_v22 }
 0x10d   : > { %v450_v39 = vsel %vm442_vm0, %v428_v31, %v446_v35  ;;  %v452_v40 = vsel %vm444_vm1, %v436_v32, %v448_v36 }
 0x10e   : > { %v618_v41 = vpack.c.bf16 %v450_v39, %v450_v39  ;;  %v620_v42 = vpack.c.bf16 %v452_v40, %v452_v40  ;;  %vm443_vm3 = vcmp.ge.f32.partialorder %v431_v37, 0.0  ;;  %v447_v43 = vmul.f32 0.1, %v431_v37 }
 0x10f   : > { %vm445_vm4 = vcmp.ge.f32.partialorder %v439_v38, 0.0  ;;  %v449_v44 = vmul.f32 0.1, %v439_v38 }
 0x110   : > { %471 = vst.msk [vmem:[%s231_s29] sm:$0xf] %vm470_vm2, %v618_v41  ;;  %473 = vst.msk [vmem:[%s231_s29 + $0x8] sm:$0xf] %vm470_vm2, %v620_v42  ;;  %v451_v45 = vsel %vm443_vm3, %v431_v37, %v447_v43 }
 0x111   : > { %v619_v46 = vpack.c.bf16 %v451_v45, %v451_v45  ;;  %v453_v47 = vsel %vm445_vm4, %v439_v38, %v449_v44 }
 0x112   : > { %v621_v48 = vpack.c.bf16 %v453_v47, %v453_v47 }
 0x113   : > { %472 = vst.msk [vmem:[%s231_s29 + $0x4] sm:$0xf] %vm470_vm2, %v619_v46 }
 0x114   : > { %474 = vst.msk [vmem:[%s231_s29 + $0xc] sm:$0xf] %vm470_vm2, %v621_v48 }
 0x115 PF: > { %s13_s14 = sadd.s32 1, %s734_s14   ;;  %s822_s12 = smov %s730_s13 }
 0x116   : > { %p10_p5 = scmp.ge.s32.totalorder %s13_s14, 6   ;;  %s823_s13 = smov %s825_s15 }
 0x118   :  { %12 = sbr.rel (!%p10_p5) target bundleno = 2 (0x2), region = 65 }

// kernel: _lambda_.12
= control target key start
LH: loop header
LB: loop body
LE: loop exit
PB: predicated region body
PF: predicated region fallthrough
CT: control target
= control target key end

     0   :  { %s760_s12 = smov 0   ;;  %s762_s13 = smov 0   ;;  %s857_s0 = inlined_call_operand.vmem [shape: bf16[4,128,128], index: 0, kind: input, shape index: {}]   ;;  %s858_s1 = inlined_call_operand.vmem [shape: bf16[4,128,2], index: 1, kind: input, shape index: {}]   ;;  %s859_s2 = inlined_call_operand.vmem [shape: f32[1,2], index: 2, kind: input, shape index: {}]   ;;  %s860_s3 = inlined_call_operand.vmem [shape: f32[4,128,2], index: 3, kind: output, shape index: {}]  }
   0x1   :  { %s764_s14 = smov 0  }
   0x2 LB: > { %s25_s15 = sadd.s32 1, %s734_s13  ;;  %p583_p0 = scmp.ge.s32.totalorder %s738_s14, 1  ;;  %s738_s14 = sphi %s764_s14, %s13_s14   ;;  %s734_s13 = sphi %s762_s13, %s862_s13   ;;  %s730_s12 = sphi %s760_s12, %s861_s12  }
   0x3   : > { %p27_p1 = scmp.ge.s32.totalorder %s25_s15, 4  ;;  %p168_p2 = scmp.lt.s32.totalorder %s738_s14, 5 }
   0x5   : > { %s864_s15 = smov (%p27_p1, %s25_s15), 0  ;;  %p169_p3 = pnand %p583_p0, %p168_p2 }
   0x6   : > { %p206_p4 = scmp.lt.s32.totalorder (!%p169_p3), %s730_s12, 3  ;;  %v590_v16 = vld [vmem:[%s859_s2] ss:$0 sm:$0xff] (!%p169_p3)  ;;  %vm463_vm0 = vcmask (!%p169_p3), 15360  }
   0x7   : > { %172 = sbr.rel (%p169_p3) target bundleno = 276 (0x114), region = 32 }
   0xe   : > { %s866_s12 = smov (!%p206_p4, %s730_s12), 3 }
   0xf   : > { %s609_s16 = sshll.u32 %s866_s12, 6  ;;  %s611_s23 = sshll.u32 %s866_s12, 7 }
  0x10   : > { %s784_s19 = scalar_lea.vmem %s858_s1, %s609_s16  ;;  %s792_s22 = scalar_lea.vmem %s857_s0, %s609_s16 }
  0x11   : > { %v700_v0 = vld [vmem:[%s784_s19] sm:$0xff]   ;;  %v701_v1 = vld [vmem:[%s784_s19 + $0x8] sm:$0xff]   ;;  %v702_v2 = vld [vmem:[%s784_s19 + $0x10] sm:$0xff]   ;;  %s814_s28 = scalar_lea.vmem %s860_s3, %s611_s23 }
  0x12   : > { %628 = vmatprep.subr.bf16.mxu0 %v700_v0  ;;  %660 = vmatprep.subr.bf16.mxu1 %v700_v0  ;;  %v703_v3 = vld [vmem:[%s784_s19 + $0x18] sm:$0xff]   ;;  %v708_v4 = vld [vmem:[%s792_s22] sm:$0xff]   ;;  %v705_v7 = vld [vmem:[%s784_s19 + $0x28] sm:$0xff]  }
  0x13   : > { %629 = vmatpush3.bf16.msra.mxu0 %v700_v0  ;;  %668 = vmatpush3.bf16.msra.mxu1 %v700_v0  ;;  %v709_v5 = vld [vmem:[%s792_s22 + $0x20] sm:$0xff]   ;;  %v706_v8 = vld [vmem:[%s784_s19 + $0x30] sm:$0xff]   ;;  %v707_v9 = vld [vmem:[%s784_s19 + $0x38] sm:$0xff]  }
  0x14   : > { %630 = vmatprep.subr.bf16.mxu0 %v701_v1  ;;  %661 = vmatprep.subr.bf16.mxu1 %v701_v1  ;;  %v704_v6 = vld [vmem:[%s784_s19 + $0x20] sm:$0xff]   ;;  %v710_v10 = vld [vmem:[%s792_s22 + $0x8] sm:$0xff]   ;;  %v712_v12 = vld [vmem:[%s792_s22 + $0x10] sm:$0xff]  }
  0x15   : > { %644 = vmatprep.mubr.bf16.mxu0 %v708_v4  ;;  %652 = vmatprep.mubr.bf16.mxu1 %v709_v5  ;;  %v711_v11 = vld [vmem:[%s792_s22 + $0x28] sm:$0xff]   ;;  %v713_v13 = vld [vmem:[%s792_s22 + $0x30] sm:$0xff]   ;;  %v714_v14 = vld [vmem:[%s792_s22 + $0x18] sm:$0xff]  }
  0x16   : > { %v715_v15 = vld [vmem:[%s792_s22 + $0x38] sm:$0xff]  }
  0x17   : > { %631 = vmatpush3.bf16.msra.mxu0 %v701_v1  ;;  %669 = vmatpush3.bf16.msra.mxu1 %v701_v1 }
  0x18   : > { %632 = vmatprep.subr.bf16.mxu0 %v702_v2  ;;  %662 = vmatprep.subr.bf16.mxu1 %v702_v2 }
  0x1b   : > { %633 = vmatpush3.bf16.msra.mxu0 %v702_v2  ;;  %670 = vmatpush3.bf16.msra.mxu1 %v702_v2 }
  0x1c   : > { %634 = vmatprep.subr.bf16.mxu0 %v703_v3  ;;  %663 = vmatprep.subr.bf16.mxu1 %v703_v3 }
  0x1f   : > { %635 = vmatpush3.bf16.msra.mxu0 %v703_v3  ;;  %671 = vmatpush3.bf16.msra.mxu1 %v703_v3 }
  0x20   : > { %636 = vmatprep.subr.bf16.mxu0 %v704_v6  ;;  %664 = vmatprep.subr.bf16.mxu1 %v704_v6 }
  0x23   : > { %637 = vmatpush3.bf16.msra.mxu0 %v704_v6  ;;  %672 = vmatpush3.bf16.msra.mxu1 %v704_v6 }
  0x24   : > { %638 = vmatprep.subr.bf16.mxu0 %v705_v7  ;;  %665 = vmatprep.subr.bf16.mxu1 %v705_v7 }
  0x27   : > { %639 = vmatpush3.bf16.msra.mxu0 %v705_v7  ;;  %673 = vmatpush3.bf16.msra.mxu1 %v705_v7 }
  0x28   : > { %640 = vmatprep.subr.bf16.mxu0 %v706_v8  ;;  %666 = vmatprep.subr.bf16.mxu1 %v706_v8 }
  0x2b   : > { %641 = vmatpush3.bf16.msra.mxu0 %v706_v8  ;;  %674 = vmatpush3.bf16.msra.mxu1 %v706_v8 }
  0x2c   : > { %642 = vmatprep.subr.bf16.mxu0 %v707_v9  ;;  %667 = vmatprep.subr.bf16.mxu1 %v707_v9 }
  0x2f   : > { %643 = vmatpush3.bf16.msra.mxu0 %v707_v9  ;;  %675 = vmatpush3.bf16.msra.mxu1 %v707_v9 }
  0x32   : > { %645 = vmatmul.mubr.bf16.vlgmr.msra.gmra.mrb[0].mxu0 %v710_v10  ;;  %653 = vmatmul.mubr.bf16.vlgmr.msra.gmra.mrb[0].mxu1 %v711_v11 }
  0x33   : > { %648 = vmatprep.mubr.bf16.mxu0 %v712_v12  ;;  %656 = vmatprep.mubr.bf16.mxu1 %v713_v13 }
  0x3a   : > { %649 = vmatmul.mubr.bf16.gmra.mrb[4].mxu0 %v714_v14  ;;  %657 = vmatmul.mubr.bf16.gmra.mrb[4].mxu1 %v715_v15 }
 0x105   : > { %v646_v17 = vpop.f32.mrb[0].mxu0  ;;  %v654_v18 = vpop.f32.mrb[0].mxu1 }
 0x106   : > { %v409_v19 = vadd.f32 %v646_v17, %v590_v16  ;;  %v441_v20 = vadd.f32 %v654_v18, %v590_v16  ;;  %v400_v21 = vpop.f32.mrb[1].mxu0  ;;  %v432_v22 = vpop.f32.mrb[1].mxu1 }
 0x107   : > { %v401_v23 = vadd.f32 %v590_v16, %v400_v21  ;;  %v433_v24 = vadd.f32 %v590_v16, %v432_v22  ;;  %v647_v25 = vpop.f32.mrb[2].mxu0  ;;  %v655_v26 = vpop.f32.mrb[2].mxu1 }
 0x108   : > { %466 = vst.msk [vmem:[%s814_s28 + $0x10] sm:$0xff] %vm463_vm0, %v409_v19  ;;  %474 = vst.msk [vmem:[%s814_s28 + $0x50] sm:$0xff] %vm463_vm0, %v441_v20  ;;  %v412_v27 = vadd.f32 %v647_v25, %v590_v16  ;;  %v444_v28 = vadd.f32 %v655_v26, %v590_v16  ;;  %v403_v29 = vpop.f32.mrb[3].mxu0  ;;  %v435_v30 = vpop.f32.mrb[3].mxu1 }
 0x109   : > { %464 = vst.msk [vmem:[%s814_s28] sm:$0xff] %vm463_vm0, %v401_v23  ;;  %472 = vst.msk [vmem:[%s814_s28 + $0x40] sm:$0xff] %vm463_vm0, %v433_v24  ;;  %v404_v31 = vadd.f32 %v590_v16, %v403_v29  ;;  %v436_v32 = vadd.f32 %v590_v16, %v435_v30 }
 0x10a   : > { %467 = vst.msk [vmem:[%s814_s28 + $0x18] sm:$0xff] %vm463_vm0, %v412_v27  ;;  %475 = vst.msk [vmem:[%s814_s28 + $0x58] sm:$0xff] %vm463_vm0, %v444_v28 }
 0x10b   : > { %465 = vst.msk [vmem:[%s814_s28 + $0x8] sm:$0xff] %vm463_vm0, %v404_v31  ;;  %473 = vst.msk [vmem:[%s814_s28 + $0x48] sm:$0xff] %vm463_vm0, %v436_v32 }
 0x10d   : > { %v650_v33 = vpop.f32.mrb[4].mxu0  ;;  %v658_v34 = vpop.f32.mrb[4].mxu1 }
 0x10e   : > { %v425_v35 = vadd.f32 %v650_v33, %v590_v16  ;;  %v457_v36 = vadd.f32 %v658_v34, %v590_v16  ;;  %v416_v37 = vpop.f32.mrb[5].mxu0  ;;  %v448_v38 = vpop.f32.mrb[5].mxu1 }
 0x10f   : > { %v417_v39 = vadd.f32 %v590_v16, %v416_v37  ;;  %v449_v40 = vadd.f32 %v590_v16, %v448_v38  ;;  %v651_v41 = vpop.f32.mrb[6].mxu0  ;;  %v659_v42 = vpop.f32.mrb[6].mxu1 }
 0x110   : > { %470 = vst.msk [vmem:[%s814_s28 + $0x30] sm:$0xff] %vm463_vm0, %v425_v35  ;;  %478 = vst.msk [vmem:[%s814_s28 + $0x70] sm:$0xff] %vm463_vm0, %v457_v36  ;;  %v428_v43 = vadd.f32 %v651_v41, %v590_v16  ;;  %v460_v44 = vadd.f32 %v659_v42, %v590_v16  ;;  %v419_v45 = vpop.f32.mrb[7].mxu0  ;;  %v451_v46 = vpop.f32.mrb[7].mxu1 }
 0x111   : > { %468 = vst.msk [vmem:[%s814_s28 + $0x20] sm:$0xff] %vm463_vm0, %v417_v39  ;;  %476 = vst.msk [vmem:[%s814_s28 + $0x60] sm:$0xff] %vm463_vm0, %v449_v40  ;;  %v420_v47 = vadd.f32 %v590_v16, %v419_v45  ;;  %v452_v48 = vadd.f32 %v590_v16, %v451_v46 }
 0x112   : > { %471 = vst.msk [vmem:[%s814_s28 + $0x38] sm:$0xff] %vm463_vm0, %v428_v43  ;;  %479 = vst.msk [vmem:[%s814_s28 + $0x78] sm:$0xff] %vm463_vm0, %v460_v44 }
 0x113   : > { %469 = vst.msk [vmem:[%s814_s28 + $0x28] sm:$0xff] %vm463_vm0, %v420_v47  ;;  %477 = vst.msk [vmem:[%s814_s28 + $0x68] sm:$0xff] %vm463_vm0, %v452_v48 }
 0x114 PF: > { %s13_s14 = sadd.s32 1, %s738_s14   ;;  %s861_s12 = smov %s734_s13 }
 0x115   : > { %p10_p5 = scmp.ge.s32.totalorder %s13_s14, 6   ;;  %s862_s13 = smov %s864_s15 }
 0x117   :  { %12 = sbr.rel (!%p10_p5) target bundleno = 2 (0x2), region = 65 }

// kernel: _lambda_.13
= control target key start
LH: loop header
LB: loop body
LE: loop exit
PB: predicated region body
PF: predicated region fallthrough
CT: control target
= control target key end

     0   :  { %s106_s0 = inlined_call_operand.vmem [shape: f32[8,512], index: 0, kind: input, shape index: {}]   ;;  %s107_s1 = inlined_call_operand.vmem [shape: f32[8,512], index: 1, kind: input, shape index: {}]   ;;  %s108_s2 = inlined_call_operand.vmem [shape: f32[8,512], index: 2, kind: output, shape index: {}]  }
   0x1   :  { %v11_v0 = vld [vmem:[%s106_s0] sm:$0xff]  ;;  %v12_v1 = vld [vmem:[%s106_s0 + $0x8] sm:$0xff]  ;;  %v13_v4 = vld [vmem:[%s106_s0 + $0x10] sm:$0xff] }
   0x2   :  { %v15_v2 = vmul.f32 0.5, %v11_v0  ;;  %v16_v3 = vmul.f32 0.5, %v12_v1  ;;  %v17_v5 = vmul.f32 0.5, %v13_v4  ;;  %v14_v6 = vld [vmem:[%s106_s0 + $0x18] sm:$0xff]  ;;  %v31_v12 = vld [vmem:[%s107_s1] sm:$0xff]  ;;  %v32_v16 = vld [vmem:[%s107_s1 + $0x8] sm:$0xff] }
   0x3   :  { %v18_v7 = vmul.f32 0.5, %v14_v6  ;;  %v33_v19 = vld [vmem:[%s107_s1 + $0x10] sm:$0xff]  ;;  %v34_v23 = vld [vmem:[%s107_s1 + $0x18] sm:$0xff] }
   0x4   :  { %47 = vtanh.f32 %v15_v2 }
   0x5   :  { %49 = vtanh.f32 %v16_v3 }
   0x6   :  { %51 = vtanh.f32 %v17_v5 }
   0x7   :  { %53 = vtanh.f32 %v18_v7 }
   0xe   :  { %v48_v8 = vpop.eup %47 }
   0xf   :  { %v50_v9 = vpop.eup %49  ;;  %v23_v10 = vmul.f32 0.5, %v48_v8 }
  0x10   :  { %v52_v11 = vpop.eup %51  ;;  %v24_v13 = vmul.f32 0.5, %v50_v9 }
  0x11   :  { %v54_v14 = vpop.eup %53  ;;  %v27_v15 = vadd.f32 0.5, %v23_v10  ;;  %v25_v17 = vmul.f32 0.5, %v52_v11 }
  0x12   :  { %v28_v18 = vadd.f32 0.5, %v24_v13  ;;  %v26_v20 = vmul.f32 0.5, %v54_v14 }
  0x13   :  { %v35_v21 = vmul.f32 %v31_v12, %v27_v15  ;;  %v29_v22 = vadd.f32 0.5, %v25_v17 }
  0x14   :  { %v36_v24 = vmul.f32 %v32_v16, %v28_v18  ;;  %v30_v25 = vadd.f32 0.5, %v26_v20 }
  0x15   :  { %39 = vst [vmem:[%s108_s2] sm:$0xff] %v35_v21  ;;  %v37_v26 = vmul.f32 %v33_v19, %v29_v22 }
  0x16   :  { %40 = vst [vmem:[%s108_s2 + $0x8] sm:$0xff] %v36_v24  ;;  %v38_v27 = vmul.f32 %v34_v23, %v30_v25 }
  0x17   :  { %41 = vst [vmem:[%s108_s2 + $0x10] sm:$0xff] %v37_v26 }
  0x18   :  { %42 = vst [vmem:[%s108_s2 + $0x18] sm:$0xff] %v38_v27 }

</bundles_post_ra>
